<compile_context>
chip_gen: v7x
topology: tpu7x:2x2x1
jax: 0.10.0
libtpu: 0.0.40
codegen_flags: <defaults>
</compile_context>

<pallas_src>
import functools

import jax
import jax.numpy as jnp
from jax.experimental import pallas as pl
from jax.experimental.pallas import tpu as pltpu

_LN_EPS = 1e-6  # EncoderNN explicitly constructs nn.LayerNorm(eps=1e-06)


def _layernorm(x, gamma, beta, eps=_LN_EPS):
    mean = jnp.mean(x, axis=-1, keepdims=True)
    var = jnp.mean((x - mean) ** 2, axis=-1, keepdims=True)
    return (x - mean) * jax.lax.rsqrt(var + eps) * gamma + beta


def encoder_kernel(xq_ref, xkv_ref,
                   wq_ref, bq_ref, wk_ref, bk_ref, wv_ref, bv_ref,
                   wo_ref, bo_ref,
                   ln1w_ref, ln1b_ref,
                   w1_ref, b1_ref, w2_ref, b2_ref,
                   ln2w_ref, ln2b_ref,
                   out_ref, concat_ref, *, num_heads):
    x_q = xq_ref[0].astype(jnp.float32)           # (TQ, D) query / residual tile
    x_kv = xkv_ref[0].astype(jnp.float32)         # (S, D) full sequence for K/V
    TQ, D = x_q.shape
    depth = D // num_heads
    scale = 1.0 / jnp.sqrt(jnp.float32(depth))

    xq_bf = x_q.astype(jnp.bfloat16)
    xkv_bf = x_kv.astype(jnp.bfloat16)

    # --- QKV projections: bf16 MXU operands, f32 accumulation ---
    q = jnp.dot(xq_bf, wq_ref[...], preferred_element_type=jnp.float32) + bq_ref[...]
    k = jnp.dot(xkv_bf, wk_ref[...], preferred_element_type=jnp.float32) + bk_ref[...]
    v = jnp.dot(xkv_bf, wv_ref[...], preferred_element_type=jnp.float32) + bv_ref[...]

    # Fold the 1/sqrt(depth) scale into q once (cheaper than scaling logits).
    q = (q * scale).astype(jnp.bfloat16)
    k = k.astype(jnp.bfloat16)
    v = v.astype(jnp.bfloat16)

    # --- Per-head attention; head results land in VMEM scratch at static offsets ---
    # TODO(synk): additive attention-mask (mask * -1e9) path not wired; mask=None only.
    for h in range(num_heads):                    # static loop over heads
        sl = slice(h * depth, (h + 1) * depth)
        # q_h @ k_h^T expressed directly as a transposed contraction (no k.T op).
        logits = jax.lax.dot_general(
            q[:, sl], k[:, sl],
            dimension_numbers=(((1,), (1,)), ((), ())),
            preferred_element_type=jnp.float32)   # (TQ, S)
        logits = logits - jnp.max(logits, axis=-1, keepdims=True)
        p = jnp.exp(logits)
        p = p * pl.reciprocal(jnp.sum(p, axis=-1, keepdims=True), approx=True)
        concat_ref[:, sl] = jnp.dot(p.astype(jnp.bfloat16), v[:, sl],
                                    preferred_element_type=jnp.float32)

    attn = jnp.dot(concat_ref[...].astype(jnp.bfloat16), wo_ref[...],
                   preferred_element_type=jnp.float32) + bo_ref[...]

    # dropout1 is identity in eval / inference mode
    out1 = _layernorm(x_q + attn, ln1w_ref[...], ln1b_ref[...])

    # --- FFN: Linear(D->F) -> ReLU -> Linear(F->D), bf16 MXU operands ---
    h1 = jnp.dot(out1.astype(jnp.bfloat16), w1_ref[...],
                 preferred_element_type=jnp.float32) + b1_ref[...]
    h1 = jnp.maximum(h1, 0.0)
    ffn = jnp.dot(h1.astype(jnp.bfloat16), w2_ref[...],
                  preferred_element_type=jnp.float32) + b2_ref[...]

    # dropout2 is identity in eval / inference mode
    out2 = _layernorm(out1 + ffn, ln2w_ref[...], ln2b_ref[...])
    out_ref[0] = out2.astype(out_ref.dtype)


def _choose_q_tile(S):
    """Largest query tile that divides S and keeps the (8,128) block rule happy."""
    if S <= 256:
        return S
    for t in (256, 128, 64, 32, 16, 8):
        if S % t == 0:
            return t
    return S


def _vmem_limit_bytes(S, TQ, D, F, H):
    """Scoped-VMEM request sized from the actual tile footprint (with headroom)."""
    bf16, f32 = 2, 4
    weight_bytes = (4 * D * D + 2 * D * F) * bf16          # matmul weights (bf16)
    small_bytes = (8 * D + F) * f32                        # biases + LN params
    x_bytes = (TQ * D + S * D) * f32                       # query tile + full-seq tile
    out_bytes = TQ * D * f32
    pipelined = 2 * (weight_bytes + small_bytes + x_bytes + out_bytes)  # double-buffer
    acts = (TQ * D + 2 * S * D + 3 * TQ * S + TQ * F + 5 * TQ * D) * f32
    need = pipelined + acts
    return int(min(max(2 * need, 32 * 1024 * 1024), 64 * 1024 * 1024))


def encoder_forward(x, params, num_heads, *, q_tile=None):
    B, S, D = x.shape
    F = params["w1"].shape[1]
    TQ = q_tile if q_tile is not None else _choose_q_tile(S)
    assert S % TQ == 0, "query tile must divide sequence length"

    # Matmul weights cast to bf16 once at the wrapper: halves HBM->VMEM DMA and
    # VMEM residency, ~2x MXU throughput.  Biases / LN params stay f32.
    bf = lambda w: w.astype(jnp.bfloat16)
    wq, wk, wv, wo = bf(params["wq"]), bf(params["wk"]), bf(params["wv"]), bf(params["wo"])
    w1, w2 = bf(params["w1"]), bf(params["w2"])

    const = lambda shape: pl.BlockSpec(shape, lambda b, qi: tuple(0 for _ in shape))
    in_specs = [
        pl.BlockSpec((1, TQ, D), lambda b, qi: (b, qi, 0)),   # x (query tile / residual)
        pl.BlockSpec((1, S, D), lambda b, qi: (b, 0, 0)),     # x (full sequence for K/V)
        const((D, D)), const((1, D)),                         # wq, bq
        const((D, D)), const((1, D)),                         # wk, bk
        const((D, D)), const((1, D)),                         # wv, bv
        const((D, D)), const((1, D)),                         # wo, bo
        const((1, D)), const((1, D)),                         # ln1 gamma, beta
        const((D, F)), const((1, F)),                         # ffn w1, b1
        const((F, D)), const((1, D)),                         # ffn w2, b2
        const((1, D)), const((1, D)),                         # ln2 gamma, beta
    ]

    flops = 2 * B * S * (4 * D * D + 2 * D * F) + 4 * B * S * S * D
    bytes_accessed = (x.size * x.dtype.itemsize * 2          # x read (q tile + kv)
                      + (4 * D * D + 2 * D * F) * 2          # bf16 weights
                      + (9 * D + F) * 4                      # biases + LN params
                      + B * S * D * 4)                       # output
    cost = pl.CostEstimate(flops=flops,
                           transcendentals=B * num_heads * S * S,
                           bytes_accessed=bytes_accessed)

    kernel = functools.partial(encoder_kernel, num_heads=num_heads)
    return pl.pallas_call(
        kernel,
        out_shape=jax.ShapeDtypeStruct((B, S, D), jnp.float32),   # explicit f32 output
        grid_spec=pltpu.PrefetchScalarGridSpec(
            num_scalar_prefetch=0,
            grid=(B, S // TQ),
            in_specs=in_specs,
            out_specs=pl.BlockSpec((1, TQ, D), lambda b, qi: (b, qi, 0)),
            scratch_shapes=[pltpu.VMEM((TQ, D), jnp.float32)],    # per-head concat buffer
        ),
        compiler_params=pltpu.CompilerParams(
            dimension_semantics=("parallel", "parallel"),
            vmem_limit_bytes=_vmem_limit_bytes(S, TQ, D, F, num_heads)),
        cost_estimate=cost,
    )(x, x,
      wq, params["bq"], wk, params["bk"], wv, params["bv"], wo, params["bo"],
      params["ln1_g"], params["ln1_b"],
      w1, params["b1"], w2, params["b2"],
      params["ln2_g"], params["ln2_b"])


def init_params(key, model_dim, ff_dim):
    ks = jax.random.split(key, 8)

    def lin(k, fan_in, fan_out):
        bound = 1.0 / jnp.sqrt(jnp.float32(fan_in))
        return jax.random.uniform(k, (fan_in, fan_out), jnp.float32, -bound, bound)

    D, F = model_dim, ff_dim
    return {
        "wq": lin(ks[0], D, D), "bq": jnp.zeros((1, D), jnp.float32),
        "wk": lin(ks[1], D, D), "bk": jnp.zeros((1, D), jnp.float32),
        "wv": lin(ks[2], D, D), "bv": jnp.zeros((1, D), jnp.float32),
        "wo": lin(ks[3], D, D), "bo": jnp.zeros((1, D), jnp.float32),
        "ln1_g": jnp.ones((1, D), jnp.float32), "ln1_b": jnp.zeros((1, D), jnp.float32),
        "w1": lin(ks[4], D, F), "b1": jnp.zeros((1, F), jnp.float32),
        "w2": lin(ks[5], F, D), "b2": jnp.zeros((1, D), jnp.float32),
        "ln2_g": jnp.ones((1, D), jnp.float32), "ln2_b": jnp.zeros((1, D), jnp.float32),
    }


def reference_forward(x, params, num_heads):
    """Pure-JAX f32 reference (same math) for sanity checking."""
    B, S, D = x.shape
    depth = D // num_heads
    q = x @ params["wq"] + params["bq"]
    k = x @ params["wk"] + params["bk"]
    v = x @ params["wv"] + params["bv"]

    def split(t):
        return jnp.transpose(t.reshape(B, S, num_heads, depth), (0, 2, 1, 3))

    q, k, v = split(q), split(k), split(v)
    logits = jnp.einsum("bhqd,bhkd->bhqk", q, k) / jnp.sqrt(jnp.float32(depth))
    p = jax.nn.softmax(logits, axis=-1)
    attn = jnp.einsum("bhqk,bhkd->bhqd", p, v)
    attn = jnp.transpose(attn, (0, 2, 1, 3)).reshape(B, S, D)
    attn = attn @ params["wo"] + params["bo"]

    def ln(t, g, b):
        m = jnp.mean(t, -1, keepdims=True)
        va = jnp.mean((t - m) ** 2, -1, keepdims=True)
        return (t - m) * jax.lax.rsqrt(va + _LN_EPS) * g + b

    out1 = ln(x + attn, params["ln1_g"], params["ln1_b"])
    ffn = jnp.maximum(out1 @ params["w1"] + params["b1"], 0.0) @ params["w2"] + params["b2"]
    return ln(out1 + ffn, params["ln2_g"], params["ln2_b"])


if __name__ == "__main__":
    B, S, D, H, F = 2, 8, 32, 4, 64

    key = jax.random.PRNGKey(0)
    kx, kp = jax.random.split(key)
    x = jax.random.normal(kx, (B, S, D), jnp.float32)
    params = init_params(kp, D, F)

    out = encoder_forward(x, params, num_heads=H)
    out = jax.block_until_ready(out)

    ref = reference_forward(x, params, num_heads=H)
    assert out.shape == (B, S, D)
    # bf16 MXU operands (f32 accumulation) -> slightly looser tolerance than pure f32.
    assert jnp.allclose(out, ref, atol=5e-2, rtol=5e-2), "mismatch vs reference"

    print("KERNEL_OK")
</pallas_src>

<mosaic_0001>
module attributes {stable_mosaic.version = 11 : i64} {
  func.func @encoder_kernel(%arg0: i32, %arg1: i32, %arg2: memref<1x8x32xf32, #tpu.memory_space<vmem>>, %arg3: memref<1x8x32xf32, #tpu.memory_space<vmem>>, %arg4: memref<32x32xbf16, #tpu.memory_space<vmem>>, %arg5: memref<1x32xf32, #tpu.memory_space<vmem>>, %arg6: memref<32x32xbf16, #tpu.memory_space<vmem>>, %arg7: memref<1x32xf32, #tpu.memory_space<vmem>>, %arg8: memref<32x32xbf16, #tpu.memory_space<vmem>>, %arg9: memref<1x32xf32, #tpu.memory_space<vmem>>, %arg10: memref<32x32xbf16, #tpu.memory_space<vmem>>, %arg11: memref<1x32xf32, #tpu.memory_space<vmem>>, %arg12: memref<1x32xf32, #tpu.memory_space<vmem>>, %arg13: memref<1x32xf32, #tpu.memory_space<vmem>>, %arg14: memref<32x64xbf16, #tpu.memory_space<vmem>>, %arg15: memref<1x64xf32, #tpu.memory_space<vmem>>, %arg16: memref<64x32xbf16, #tpu.memory_space<vmem>>, %arg17: memref<1x32xf32, #tpu.memory_space<vmem>>, %arg18: memref<1x32xf32, #tpu.memory_space<vmem>>, %arg19: memref<1x32xf32, #tpu.memory_space<vmem>>, %arg20: memref<1x8x32xf32, #tpu.memory_space<vmem>>, %arg21: memref<8x32xf32, #tpu.memory_space<vmem>>) attributes {dimension_semantics = [#tpu.dimension_semantics<parallel>, #tpu.dimension_semantics<parallel>], iteration_bounds = array<i64: 2, 1>, scalar_prefetch = 0 : i64, scratch_operands = 1 : i64, tpu.core_type = #tpu.core_type<tc>, window_params = [{transform_indices = @transform_0, window_bounds = array<i64: 1, 8, 32>}, {transform_indices = @transform_1, window_bounds = array<i64: 1, 8, 32>}, {pipeline_mode = #tpu.pipeline_mode<synchronous>, transform_indices = @transform_2, window_bounds = array<i64: 32, 32>}, {pipeline_mode = #tpu.pipeline_mode<synchronous>, transform_indices = @transform_3, window_bounds = array<i64: 1, 32>}, {pipeline_mode = #tpu.pipeline_mode<synchronous>, transform_indices = @transform_4, window_bounds = array<i64: 32, 32>}, {pipeline_mode = #tpu.pipeline_mode<synchronous>, transform_indices = @transform_5, window_bounds = array<i64: 1, 32>}, {pipeline_mode = #tpu.pipeline_mode<synchronous>, transform_indices = @transform_6, window_bounds = array<i64: 32, 32>}, {pipeline_mode = #tpu.pipeline_mode<synchronous>, transform_indices = @transform_7, window_bounds = array<i64: 1, 32>}, {pipeline_mode = #tpu.pipeline_mode<synchronous>, transform_indices = @transform_8, window_bounds = array<i64: 32, 32>}, {pipeline_mode = #tpu.pipeline_mode<synchronous>, transform_indices = @transform_9, window_bounds = array<i64: 1, 32>}, {pipeline_mode = #tpu.pipeline_mode<synchronous>, transform_indices = @transform_10, window_bounds = array<i64: 1, 32>}, {pipeline_mode = #tpu.pipeline_mode<synchronous>, transform_indices = @transform_11, window_bounds = array<i64: 1, 32>}, {pipeline_mode = #tpu.pipeline_mode<synchronous>, transform_indices = @transform_12, window_bounds = array<i64: 32, 64>}, {pipeline_mode = #tpu.pipeline_mode<synchronous>, transform_indices = @transform_13, window_bounds = array<i64: 1, 64>}, {pipeline_mode = #tpu.pipeline_mode<synchronous>, transform_indices = @transform_14, window_bounds = array<i64: 64, 32>}, {pipeline_mode = #tpu.pipeline_mode<synchronous>, transform_indices = @transform_15, window_bounds = array<i64: 1, 32>}, {pipeline_mode = #tpu.pipeline_mode<synchronous>, transform_indices = @transform_16, window_bounds = array<i64: 1, 32>}, {pipeline_mode = #tpu.pipeline_mode<synchronous>, transform_indices = @transform_17, window_bounds = array<i64: 1, 32>}, {transform_indices = @transform_18, window_bounds = array<i64: 1, 8, 32>}]} {
    %c0 = arith.constant 0 : index
    %c0_0 = arith.constant 0 : index
    %c0_1 = arith.constant 0 : index
    %0 = vector.load %arg2[%c0, %c0_0, %c0_1] : memref<1x8x32xf32, #tpu.memory_space<vmem>>, vector<1x8x32xf32>
    %1 = vector.shape_cast %0 : vector<1x8x32xf32> to vector<8x32xf32>
    %c0_2 = arith.constant 0 : index
    %c0_3 = arith.constant 0 : index
    %c0_4 = arith.constant 0 : index
    %2 = vector.load %arg3[%c0_2, %c0_3, %c0_4] : memref<1x8x32xf32, #tpu.memory_space<vmem>>, vector<1x8x32xf32>
    %3 = vector.shape_cast %2 : vector<1x8x32xf32> to vector<8x32xf32>
    %cst = arith.constant 8.000000e+00 : f32
    %4 = math.sqrt %cst : f32
    %cst_5 = arith.constant 1.000000e+00 : f32
    %5 = arith.divf %cst_5, %4 : f32
    %6 = arith.truncf %1 : vector<8x32xf32> to vector<8x32xbf16>
    %7 = arith.truncf %3 : vector<8x32xf32> to vector<8x32xbf16>
    %c0_6 = arith.constant 0 : index
    %c0_7 = arith.constant 0 : index
    %8 = vector.load %arg4[%c0_6, %c0_7] : memref<32x32xbf16, #tpu.memory_space<vmem>>, vector<32x32xbf16>
    %cst_8 = arith.constant dense<0.000000e+00> : vector<8x32xf32>
    %9 = tpu.matmul %6, %8, %cst_8 {dimension_numbers = #tpu.dot_dimension_numbers<[1], [0], [0], [1], [0, 0, 1, 1], [], []>} : vector<8x32xbf16>, vector<32x32xbf16>, vector<8x32xf32> -> vector<8x32xf32>
    %c0_9 = arith.constant 0 : index
    %c0_10 = arith.constant 0 : index
    %10 = vector.load %arg5[%c0_9, %c0_10] : memref<1x32xf32, #tpu.memory_space<vmem>>, vector<1x32xf32>
    %11 = vector.broadcast %10 : vector<1x32xf32> to vector<8x32xf32>
    %12 = arith.addf %9, %11 : vector<8x32xf32>
    %c0_11 = arith.constant 0 : index
    %c0_12 = arith.constant 0 : index
    %13 = vector.load %arg6[%c0_11, %c0_12] : memref<32x32xbf16, #tpu.memory_space<vmem>>, vector<32x32xbf16>
    %cst_13 = arith.constant dense<0.000000e+00> : vector<8x32xf32>
    %14 = tpu.matmul %7, %13, %cst_13 {dimension_numbers = #tpu.dot_dimension_numbers<[1], [0], [0], [1], [0, 0, 1, 1], [], []>} : vector<8x32xbf16>, vector<32x32xbf16>, vector<8x32xf32> -> vector<8x32xf32>
    %c0_14 = arith.constant 0 : index
    %c0_15 = arith.constant 0 : index
    %15 = vector.load %arg7[%c0_14, %c0_15] : memref<1x32xf32, #tpu.memory_space<vmem>>, vector<1x32xf32>
    %16 = vector.broadcast %15 : vector<1x32xf32> to vector<8x32xf32>
    %17 = arith.addf %14, %16 : vector<8x32xf32>
    %c0_16 = arith.constant 0 : index
    %c0_17 = arith.constant 0 : index
    %18 = vector.load %arg8[%c0_16, %c0_17] : memref<32x32xbf16, #tpu.memory_space<vmem>>, vector<32x32xbf16>
    %cst_18 = arith.constant dense<0.000000e+00> : vector<8x32xf32>
    %19 = tpu.matmul %7, %18, %cst_18 {dimension_numbers = #tpu.dot_dimension_numbers<[1], [0], [0], [1], [0, 0, 1, 1], [], []>} : vector<8x32xbf16>, vector<32x32xbf16>, vector<8x32xf32> -> vector<8x32xf32>
    %c0_19 = arith.constant 0 : index
    %c0_20 = arith.constant 0 : index
    %20 = vector.load %arg9[%c0_19, %c0_20] : memref<1x32xf32, #tpu.memory_space<vmem>>, vector<1x32xf32>
    %21 = vector.broadcast %20 : vector<1x32xf32> to vector<8x32xf32>
    %22 = arith.addf %19, %21 : vector<8x32xf32>
    %23 = vector.broadcast %5 : f32 to vector<8x32xf32>
    %24 = arith.mulf %12, %23 : vector<8x32xf32>
    %25 = arith.truncf %24 : vector<8x32xf32> to vector<8x32xbf16>
    %26 = arith.truncf %17 : vector<8x32xf32> to vector<8x32xbf16>
    %27 = arith.truncf %22 : vector<8x32xf32> to vector<8x32xbf16>
    %28 = vector.extract_strided_slice %25 {offsets = [0, 0], sizes = [8, 8], strides = [1, 1]} : vector<8x32xbf16> to vector<8x8xbf16>
    %29 = vector.extract_strided_slice %26 {offsets = [0, 0], sizes = [8, 8], strides = [1, 1]} : vector<8x32xbf16> to vector<8x8xbf16>
    %cst_21 = arith.constant dense<0.000000e+00> : vector<8x8xf32>
    %30 = tpu.matmul %28, %29, %cst_21 {dimension_numbers = #tpu.dot_dimension_numbers<[1], [1], [0], [0], [0, 0, 1, 0], [], []>} : vector<8x8xbf16>, vector<8x8xbf16>, vector<8x8xf32> -> vector<8x8xf32>
    %cst_22 = arith.constant dense<0xFF800000> : vector<8xf32>
    %31 = vector.multi_reduction <maximumf>, %30, %cst_22 [1] : vector<8x8xf32> to vector<8xf32>
    %32 = vector.shape_cast %31 : vector<8xf32> to vector<8x1xf32>
    %33 = vector.broadcast %32 : vector<8x1xf32> to vector<8x8xf32>
    %34 = arith.subf %30, %33 : vector<8x8xf32>
    %35 = math.exp %34 : vector<8x8xf32>
    %cst_23 = arith.constant dense<0.000000e+00> : vector<8xf32>
    %36 = vector.multi_reduction <add>, %35, %cst_23 [1] : vector<8x8xf32> to vector<8xf32>
    %37 = vector.shape_cast %36 : vector<8xf32> to vector<8x1xf32>
    %38 = tpu.reciprocal %37 {approx = true} : vector<8x1xf32> -> vector<8x1xf32>
    %39 = vector.broadcast %38 : vector<8x1xf32> to vector<8x8xf32>
    %40 = arith.mulf %35, %39 : vector<8x8xf32>
    %41 = arith.truncf %40 : vector<8x8xf32> to vector<8x8xbf16>
    %42 = vector.extract_strided_slice %27 {offsets = [0, 0], sizes = [8, 8], strides = [1, 1]} : vector<8x32xbf16> to vector<8x8xbf16>
    %cst_24 = arith.constant dense<0.000000e+00> : vector<8x8xf32>
    %43 = tpu.matmul %41, %42, %cst_24 {dimension_numbers = #tpu.dot_dimension_numbers<[1], [0], [0], [1], [0, 0, 1, 1], [], []>} : vector<8x8xbf16>, vector<8x8xbf16>, vector<8x8xf32> -> vector<8x8xf32>
    %c0_25 = arith.constant 0 : index
    %c0_26 = arith.constant 0 : index
    %44 = vector.load %arg21[%c0_25, %c0_26] : memref<8x32xf32, #tpu.memory_space<vmem>>, vector<8x8xf32>
    tpu.vector_store %arg21[%c0_25, %c0_26], %43 {strides = array<i32>} : memref<8x32xf32, #tpu.memory_space<vmem>>, vector<8x8xf32>,
    %45 = vector.extract_strided_slice %25 {offsets = [0, 8], sizes = [8, 8], strides = [1, 1]} : vector<8x32xbf16> to vector<8x8xbf16>
    %46 = vector.extract_strided_slice %26 {offsets = [0, 8], sizes = [8, 8], strides = [1, 1]} : vector<8x32xbf16> to vector<8x8xbf16>
    %cst_27 = arith.constant dense<0.000000e+00> : vector<8x8xf32>
    %47 = tpu.matmul %45, %46, %cst_27 {dimension_numbers = #tpu.dot_dimension_numbers<[1], [1], [0], [0], [0, 0, 1, 0], [], []>} : vector<8x8xbf16>, vector<8x8xbf16>, vector<8x8xf32> -> vector<8x8xf32>
    %cst_28 = arith.constant dense<0xFF800000> : vector<8xf32>
    %48 = vector.multi_reduction <maximumf>, %47, %cst_28 [1] : vector<8x8xf32> to vector<8xf32>
    %49 = vector.shape_cast %48 : vector<8xf32> to vector<8x1xf32>
    %50 = vector.broadcast %49 : vector<8x1xf32> to vector<8x8xf32>
    %51 = arith.subf %47, %50 : vector<8x8xf32>
    %52 = math.exp %51 : vector<8x8xf32>
    %cst_29 = arith.constant dense<0.000000e+00> : vector<8xf32>
    %53 = vector.multi_reduction <add>, %52, %cst_29 [1] : vector<8x8xf32> to vector<8xf32>
    %54 = vector.shape_cast %53 : vector<8xf32> to vector<8x1xf32>
    %55 = tpu.reciprocal %54 {approx = true} : vector<8x1xf32> -> vector<8x1xf32>
    %56 = vector.broadcast %55 : vector<8x1xf32> to vector<8x8xf32>
    %57 = arith.mulf %52, %56 : vector<8x8xf32>
    %58 = arith.truncf %57 : vector<8x8xf32> to vector<8x8xbf16>
    %59 = vector.extract_strided_slice %27 {offsets = [0, 8], sizes = [8, 8], strides = [1, 1]} : vector<8x32xbf16> to vector<8x8xbf16>
    %cst_30 = arith.constant dense<0.000000e+00> : vector<8x8xf32>
    %60 = tpu.matmul %58, %59, %cst_30 {dimension_numbers = #tpu.dot_dimension_numbers<[1], [0], [0], [1], [0, 0, 1, 1], [], []>} : vector<8x8xbf16>, vector<8x8xbf16>, vector<8x8xf32> -> vector<8x8xf32>
    %c0_31 = arith.constant 0 : index
    %c8 = arith.constant 8 : index
    %61 = vector.load %arg21[%c0_31, %c8] : memref<8x32xf32, #tpu.memory_space<vmem>>, vector<8x8xf32>
    tpu.vector_store %arg21[%c0_31, %c8], %60 {strides = array<i32>} : memref<8x32xf32, #tpu.memory_space<vmem>>, vector<8x8xf32>,
    %62 = vector.extract_strided_slice %25 {offsets = [0, 16], sizes = [8, 8], strides = [1, 1]} : vector<8x32xbf16> to vector<8x8xbf16>
    %63 = vector.extract_strided_slice %26 {offsets = [0, 16], sizes = [8, 8], strides = [1, 1]} : vector<8x32xbf16> to vector<8x8xbf16>
    %cst_32 = arith.constant dense<0.000000e+00> : vector<8x8xf32>
    %64 = tpu.matmul %62, %63, %cst_32 {dimension_numbers = #tpu.dot_dimension_numbers<[1], [1], [0], [0], [0, 0, 1, 0], [], []>} : vector<8x8xbf16>, vector<8x8xbf16>, vector<8x8xf32> -> vector<8x8xf32>
    %cst_33 = arith.constant dense<0xFF800000> : vector<8xf32>
    %65 = vector.multi_reduction <maximumf>, %64, %cst_33 [1] : vector<8x8xf32> to vector<8xf32>
    %66 = vector.shape_cast %65 : vector<8xf32> to vector<8x1xf32>
    %67 = vector.broadcast %66 : vector<8x1xf32> to vector<8x8xf32>
    %68 = arith.subf %64, %67 : vector<8x8xf32>
    %69 = math.exp %68 : vector<8x8xf32>
    %cst_34 = arith.constant dense<0.000000e+00> : vector<8xf32>
    %70 = vector.multi_reduction <add>, %69, %cst_34 [1] : vector<8x8xf32> to vector<8xf32>
    %71 = vector.shape_cast %70 : vector<8xf32> to vector<8x1xf32>
    %72 = tpu.reciprocal %71 {approx = true} : vector<8x1xf32> -> vector<8x1xf32>
    %73 = vector.broadcast %72 : vector<8x1xf32> to vector<8x8xf32>
    %74 = arith.mulf %69, %73 : vector<8x8xf32>
    %75 = arith.truncf %74 : vector<8x8xf32> to vector<8x8xbf16>
    %76 = vector.extract_strided_slice %27 {offsets = [0, 16], sizes = [8, 8], strides = [1, 1]} : vector<8x32xbf16> to vector<8x8xbf16>
    %cst_35 = arith.constant dense<0.000000e+00> : vector<8x8xf32>
    %77 = tpu.matmul %75, %76, %cst_35 {dimension_numbers = #tpu.dot_dimension_numbers<[1], [0], [0], [1], [0, 0, 1, 1], [], []>} : vector<8x8xbf16>, vector<8x8xbf16>, vector<8x8xf32> -> vector<8x8xf32>
    %c0_36 = arith.constant 0 : index
    %c16 = arith.constant 16 : index
    %78 = vector.load %arg21[%c0_36, %c16] : memref<8x32xf32, #tpu.memory_space<vmem>>, vector<8x8xf32>
    tpu.vector_store %arg21[%c0_36, %c16], %77 {strides = array<i32>} : memref<8x32xf32, #tpu.memory_space<vmem>>, vector<8x8xf32>,
    %79 = vector.extract_strided_slice %25 {offsets = [0, 24], sizes = [8, 8], strides = [1, 1]} : vector<8x32xbf16> to vector<8x8xbf16>
    %80 = vector.extract_strided_slice %26 {offsets = [0, 24], sizes = [8, 8], strides = [1, 1]} : vector<8x32xbf16> to vector<8x8xbf16>
    %cst_37 = arith.constant dense<0.000000e+00> : vector<8x8xf32>
    %81 = tpu.matmul %79, %80, %cst_37 {dimension_numbers = #tpu.dot_dimension_numbers<[1], [1], [0], [0], [0, 0, 1, 0], [], []>} : vector<8x8xbf16>, vector<8x8xbf16>, vector<8x8xf32> -> vector<8x8xf32>
    %cst_38 = arith.constant dense<0xFF800000> : vector<8xf32>
    %82 = vector.multi_reduction <maximumf>, %81, %cst_38 [1] : vector<8x8xf32> to vector<8xf32>
    %83 = vector.shape_cast %82 : vector<8xf32> to vector<8x1xf32>
    %84 = vector.broadcast %83 : vector<8x1xf32> to vector<8x8xf32>
    %85 = arith.subf %81, %84 : vector<8x8xf32>
    %86 = math.exp %85 : vector<8x8xf32>
    %cst_39 = arith.constant dense<0.000000e+00> : vector<8xf32>
    %87 = vector.multi_reduction <add>, %86, %cst_39 [1] : vector<8x8xf32> to vector<8xf32>
    %88 = vector.shape_cast %87 : vector<8xf32> to vector<8x1xf32>
    %89 = tpu.reciprocal %88 {approx = true} : vector<8x1xf32> -> vector<8x1xf32>
    %90 = vector.broadcast %89 : vector<8x1xf32> to vector<8x8xf32>
    %91 = arith.mulf %86, %90 : vector<8x8xf32>
    %92 = arith.truncf %91 : vector<8x8xf32> to vector<8x8xbf16>
    %93 = vector.extract_strided_slice %27 {offsets = [0, 24], sizes = [8, 8], strides = [1, 1]} : vector<8x32xbf16> to vector<8x8xbf16>
    %cst_40 = arith.constant dense<0.000000e+00> : vector<8x8xf32>
    %94 = tpu.matmul %92, %93, %cst_40 {dimension_numbers = #tpu.dot_dimension_numbers<[1], [0], [0], [1], [0, 0, 1, 1], [], []>} : vector<8x8xbf16>, vector<8x8xbf16>, vector<8x8xf32> -> vector<8x8xf32>
    %c0_41 = arith.constant 0 : index
    %c24 = arith.constant 24 : index
    %95 = vector.load %arg21[%c0_41, %c24] : memref<8x32xf32, #tpu.memory_space<vmem>>, vector<8x8xf32>
    tpu.vector_store %arg21[%c0_41, %c24], %94 {strides = array<i32>} : memref<8x32xf32, #tpu.memory_space<vmem>>, vector<8x8xf32>,
    %c0_42 = arith.constant 0 : index
    %c0_43 = arith.constant 0 : index
    %96 = vector.load %arg21[%c0_42, %c0_43] : memref<8x32xf32, #tpu.memory_space<vmem>>, vector<8x32xf32>
    %97 = arith.truncf %96 : vector<8x32xf32> to vector<8x32xbf16>
    %c0_44 = arith.constant 0 : index
    %c0_45 = arith.constant 0 : index
    %98 = vector.load %arg10[%c0_44, %c0_45] : memref<32x32xbf16, #tpu.memory_space<vmem>>, vector<32x32xbf16>
    %cst_46 = arith.constant dense<0.000000e+00> : vector<8x32xf32>
    %99 = tpu.matmul %97, %98, %cst_46 {dimension_numbers = #tpu.dot_dimension_numbers<[1], [0], [0], [1], [0, 0, 1, 1], [], []>} : vector<8x32xbf16>, vector<32x32xbf16>, vector<8x32xf32> -> vector<8x32xf32>
    %c0_47 = arith.constant 0 : index
    %c0_48 = arith.constant 0 : index
    %100 = vector.load %arg11[%c0_47, %c0_48] : memref<1x32xf32, #tpu.memory_space<vmem>>, vector<1x32xf32>
    %101 = vector.broadcast %100 : vector<1x32xf32> to vector<8x32xf32>
    %102 = arith.addf %99, %101 : vector<8x32xf32>
    %103 = arith.addf %1, %102 : vector<8x32xf32>
    %c0_49 = arith.constant 0 : index
    %c0_50 = arith.constant 0 : index
    %104 = vector.load %arg12[%c0_49, %c0_50] : memref<1x32xf32, #tpu.memory_space<vmem>>, vector<1x32xf32>
    %c0_51 = arith.constant 0 : index
    %c0_52 = arith.constant 0 : index
    %105 = vector.load %arg13[%c0_51, %c0_52] : memref<1x32xf32, #tpu.memory_space<vmem>>, vector<1x32xf32>
    %cst_53 = arith.constant dense<0.000000e+00> : vector<8xf32>
    %106 = vector.multi_reduction <add>, %103, %cst_53 [1] : vector<8x32xf32> to vector<8xf32>
    %107 = vector.shape_cast %106 : vector<8xf32> to vector<8x1xf32>
    %cst_54 = arith.constant 3.200000e+01 : f32
    %108 = vector.broadcast %cst_54 : f32 to vector<8x1xf32>
    %109 = arith.divf %107, %108 : vector<8x1xf32>
    %110 = vector.broadcast %109 : vector<8x1xf32> to vector<8x32xf32>
    %111 = arith.subf %103, %110 : vector<8x32xf32>
    %112 = arith.mulf %111, %111 : vector<8x32xf32>
    %cst_55 = arith.constant dense<0.000000e+00> : vector<8xf32>
    %113 = vector.multi_reduction <add>, %112, %cst_55 [1] : vector<8x32xf32> to vector<8xf32>
    %114 = vector.shape_cast %113 : vector<8xf32> to vector<8x1xf32>
    %cst_56 = arith.constant 3.200000e+01 : f32
    %115 = vector.broadcast %cst_56 : f32 to vector<8x1xf32>
    %116 = arith.divf %114, %115 : vector<8x1xf32>
    %117 = vector.broadcast %109 : vector<8x1xf32> to vector<8x32xf32>
    %118 = arith.subf %103, %117 : vector<8x32xf32>
    %cst_57 = arith.constant 9.99999997E-7 : f32
    %119 = vector.broadcast %cst_57 : f32 to vector<8x1xf32>
    %120 = arith.addf %116, %119 : vector<8x1xf32>
    %121 = math.rsqrt %120 : vector<8x1xf32>
    %122 = vector.broadcast %121 : vector<8x1xf32> to vector<8x32xf32>
    %123 = arith.mulf %118, %122 : vector<8x32xf32>
    %124 = vector.broadcast %104 : vector<1x32xf32> to vector<8x32xf32>
    %125 = arith.mulf %123, %124 : vector<8x32xf32>
    %126 = vector.broadcast %105 : vector<1x32xf32> to vector<8x32xf32>
    %127 = arith.addf %125, %126 : vector<8x32xf32>
    %128 = arith.truncf %127 : vector<8x32xf32> to vector<8x32xbf16>
    %c0_58 = arith.constant 0 : index
    %c0_59 = arith.constant 0 : index
    %129 = vector.load %arg14[%c0_58, %c0_59] : memref<32x64xbf16, #tpu.memory_space<vmem>>, vector<32x64xbf16>
    %cst_60 = arith.constant dense<0.000000e+00> : vector<8x64xf32>
    %130 = tpu.matmul %128, %129, %cst_60 {dimension_numbers = #tpu.dot_dimension_numbers<[1], [0], [0], [1], [0, 0, 1, 1], [], []>} : vector<8x32xbf16>, vector<32x64xbf16>, vector<8x64xf32> -> vector<8x64xf32>
    %c0_61 = arith.constant 0 : index
    %c0_62 = arith.constant 0 : index
    %131 = vector.load %arg15[%c0_61, %c0_62] : memref<1x64xf32, #tpu.memory_space<vmem>>, vector<1x64xf32>
    %132 = vector.broadcast %131 : vector<1x64xf32> to vector<8x64xf32>
    %133 = arith.addf %130, %132 : vector<8x64xf32>
    %cst_63 = arith.constant 0.000000e+00 : f32
    %134 = vector.broadcast %cst_63 : f32 to vector<8x64xf32>
    %135 = arith.maximumf %133, %134 : vector<8x64xf32>
    %136 = arith.truncf %135 : vector<8x64xf32> to vector<8x64xbf16>
    %c0_64 = arith.constant 0 : index
    %c0_65 = arith.constant 0 : index
    %137 = vector.load %arg16[%c0_64, %c0_65] : memref<64x32xbf16, #tpu.memory_space<vmem>>, vector<64x32xbf16>
    %cst_66 = arith.constant dense<0.000000e+00> : vector<8x32xf32>
    %138 = tpu.matmul %136, %137, %cst_66 {dimension_numbers = #tpu.dot_dimension_numbers<[1], [0], [0], [1], [0, 0, 1, 1], [], []>} : vector<8x64xbf16>, vector<64x32xbf16>, vector<8x32xf32> -> vector<8x32xf32>
    %c0_67 = arith.constant 0 : index
    %c0_68 = arith.constant 0 : index
    %139 = vector.load %arg17[%c0_67, %c0_68] : memref<1x32xf32, #tpu.memory_space<vmem>>, vector<1x32xf32>
    %140 = vector.broadcast %139 : vector<1x32xf32> to vector<8x32xf32>
    %141 = arith.addf %138, %140 : vector<8x32xf32>
    %142 = arith.addf %127, %141 : vector<8x32xf32>
    %c0_69 = arith.constant 0 : index
    %c0_70 = arith.constant 0 : index
    %143 = vector.load %arg18[%c0_69, %c0_70] : memref<1x32xf32, #tpu.memory_space<vmem>>, vector<1x32xf32>
    %c0_71 = arith.constant 0 : index
    %c0_72 = arith.constant 0 : index
    %144 = vector.load %arg19[%c0_71, %c0_72] : memref<1x32xf32, #tpu.memory_space<vmem>>, vector<1x32xf32>
    %cst_73 = arith.constant dense<0.000000e+00> : vector<8xf32>
    %145 = vector.multi_reduction <add>, %142, %cst_73 [1] : vector<8x32xf32> to vector<8xf32>
    %146 = vector.shape_cast %145 : vector<8xf32> to vector<8x1xf32>
    %cst_74 = arith.constant 3.200000e+01 : f32
    %147 = vector.broadcast %cst_74 : f32 to vector<8x1xf32>
    %148 = arith.divf %146, %147 : vector<8x1xf32>
    %149 = vector.broadcast %148 : vector<8x1xf32> to vector<8x32xf32>
    %150 = arith.subf %142, %149 : vector<8x32xf32>
    %151 = arith.mulf %150, %150 : vector<8x32xf32>
    %cst_75 = arith.constant dense<0.000000e+00> : vector<8xf32>
    %152 = vector.multi_reduction <add>, %151, %cst_75 [1] : vector<8x32xf32> to vector<8xf32>
    %153 = vector.shape_cast %152 : vector<8xf32> to vector<8x1xf32>
    %cst_76 = arith.constant 3.200000e+01 : f32
    %154 = vector.broadcast %cst_76 : f32 to vector<8x1xf32>
    %155 = arith.divf %153, %154 : vector<8x1xf32>
    %156 = vector.broadcast %148 : vector<8x1xf32> to vector<8x32xf32>
    %157 = arith.subf %142, %156 : vector<8x32xf32>
    %cst_77 = arith.constant 9.99999997E-7 : f32
    %158 = vector.broadcast %cst_77 : f32 to vector<8x1xf32>
    %159 = arith.addf %155, %158 : vector<8x1xf32>
    %160 = math.rsqrt %159 : vector<8x1xf32>
    %161 = vector.broadcast %160 : vector<8x1xf32> to vector<8x32xf32>
    %162 = arith.mulf %157, %161 : vector<8x32xf32>
    %163 = vector.broadcast %143 : vector<1x32xf32> to vector<8x32xf32>
    %164 = arith.mulf %162, %163 : vector<8x32xf32>
    %165 = vector.broadcast %144 : vector<1x32xf32> to vector<8x32xf32>
    %166 = arith.addf %164, %165 : vector<8x32xf32>
    %c0_78 = arith.constant 0 : index
    %c0_79 = arith.constant 0 : index
    %c0_80 = arith.constant 0 : index
    %167 = vector.load %arg20[%c0_78, %c0_79, %c0_80] : memref<1x8x32xf32, #tpu.memory_space<vmem>>, vector<1x8x32xf32>
    %168 = vector.shape_cast %167 : vector<1x8x32xf32> to vector<8x32xf32>
    %169 = vector.shape_cast %166 : vector<8x32xf32> to vector<1x8x32xf32>
    tpu.vector_store %arg20[%c0_78, %c0_79, %c0_80], %169 {strides = array<i32>} : memref<1x8x32xf32, #tpu.memory_space<vmem>>, vector<1x8x32xf32>,
    return
  }
  func.func @transform_0(%arg0: i32, %arg1: i32) -> (i32, i32, i32) {
    %c0_i32 = arith.constant 0 : i32
    %c0_i32_0 = arith.constant 0 : i32
    return %arg0, %arg1, %c0_i32 : i32, i32, i32
  }
  func.func @transform_1(%arg0: i32, %arg1: i32) -> (i32, i32, i32) {
    %c0_i32 = arith.constant 0 : i32
    %c0_i32_0 = arith.constant 0 : i32
    %c0_i32_1 = arith.constant 0 : i32
    return %arg0, %c0_i32, %c0_i32_0 : i32, i32, i32
  }
  func.func @transform_2(%arg0: i32, %arg1: i32) -> (i32, i32) {
    %c0_i32 = arith.constant 0 : i32
    %c0_i32_0 = arith.constant 0 : i32
    %c0_i32_1 = arith.constant 0 : i32
    return %c0_i32, %c0_i32_0 : i32, i32
  }
  func.func @transform_3(%arg0: i32, %arg1: i32) -> (i32, i32) {
    %c0_i32 = arith.constant 0 : i32
    %c0_i32_0 = arith.constant 0 : i32
    %c0_i32_1 = arith.constant 0 : i32
    return %c0_i32, %c0_i32_0 : i32, i32
  }
  func.func @transform_4(%arg0: i32, %arg1: i32) -> (i32, i32) {
    %c0_i32 = arith.constant 0 : i32
    %c0_i32_0 = arith.constant 0 : i32
    %c0_i32_1 = arith.constant 0 : i32
    return %c0_i32, %c0_i32_0 : i32, i32
  }
  func.func @transform_5(%arg0: i32, %arg1: i32) -> (i32, i32) {
    %c0_i32 = arith.constant 0 : i32
    %c0_i32_0 = arith.constant 0 : i32
    %c0_i32_1 = arith.constant 0 : i32
    return %c0_i32, %c0_i32_0 : i32, i32
  }
  func.func @transform_6(%arg0: i32, %arg1: i32) -> (i32, i32) {
    %c0_i32 = arith.constant 0 : i32
    %c0_i32_0 = arith.constant 0 : i32
    %c0_i32_1 = arith.constant 0 : i32
    return %c0_i32, %c0_i32_0 : i32, i32
  }
  func.func @transform_7(%arg0: i32, %arg1: i32) -> (i32, i32) {
    %c0_i32 = arith.constant 0 : i32
    %c0_i32_0 = arith.constant 0 : i32
    %c0_i32_1 = arith.constant 0 : i32
    return %c0_i32, %c0_i32_0 : i32, i32
  }
  func.func @transform_8(%arg0: i32, %arg1: i32) -> (i32, i32) {
    %c0_i32 = arith.constant 0 : i32
    %c0_i32_0 = arith.constant 0 : i32
    %c0_i32_1 = arith.constant 0 : i32
    return %c0_i32, %c0_i32_0 : i32, i32
  }
  func.func @transform_9(%arg0: i32, %arg1: i32) -> (i32, i32) {
    %c0_i32 = arith.constant 0 : i32
    %c0_i32_0 = arith.constant 0 : i32
    %c0_i32_1 = arith.constant 0 : i32
    return %c0_i32, %c0_i32_0 : i32, i32
  }
  func.func @transform_10(%arg0: i32, %arg1: i32) -> (i32, i32) {
    %c0_i32 = arith.constant 0 : i32
    %c0_i32_0 = arith.constant 0 : i32
    %c0_i32_1 = arith.constant 0 : i32
    return %c0_i32, %c0_i32_0 : i32, i32
  }
  func.func @transform_11(%arg0: i32, %arg1: i32) -> (i32, i32) {
    %c0_i32 = arith.constant 0 : i32
    %c0_i32_0 = arith.constant 0 : i32
    %c0_i32_1 = arith.constant 0 : i32
    return %c0_i32, %c0_i32_0 : i32, i32
  }
  func.func @transform_12(%arg0: i32, %arg1: i32) -> (i32, i32) {
    %c0_i32 = arith.constant 0 : i32
    %c0_i32_0 = arith.constant 0 : i32
    %c0_i32_1 = arith.constant 0 : i32
    return %c0_i32, %c0_i32_0 : i32, i32
  }
  func.func @transform_13(%arg0: i32, %arg1: i32) -> (i32, i32) {
    %c0_i32 = arith.constant 0 : i32
    %c0_i32_0 = arith.constant 0 : i32
    %c0_i32_1 = arith.constant 0 : i32
    return %c0_i32, %c0_i32_0 : i32, i32
  }
  func.func @transform_14(%arg0: i32, %arg1: i32) -> (i32, i32) {
    %c0_i32 = arith.constant 0 : i32
    %c0_i32_0 = arith.constant 0 : i32
    %c0_i32_1 = arith.constant 0 : i32
    return %c0_i32, %c0_i32_0 : i32, i32
  }
  func.func @transform_15(%arg0: i32, %arg1: i32) -> (i32, i32) {
    %c0_i32 = arith.constant 0 : i32
    %c0_i32_0 = arith.constant 0 : i32
    %c0_i32_1 = arith.constant 0 : i32
    return %c0_i32, %c0_i32_0 : i32, i32
  }
  func.func @transform_16(%arg0: i32, %arg1: i32) -> (i32, i32) {
    %c0_i32 = arith.constant 0 : i32
    %c0_i32_0 = arith.constant 0 : i32
    %c0_i32_1 = arith.constant 0 : i32
    return %c0_i32, %c0_i32_0 : i32, i32
  }
  func.func @transform_17(%arg0: i32, %arg1: i32) -> (i32, i32) {
    %c0_i32 = arith.constant 0 : i32
    %c0_i32_0 = arith.constant 0 : i32
    %c0_i32_1 = arith.constant 0 : i32
    return %c0_i32, %c0_i32_0 : i32, i32
  }
  func.func @transform_18(%arg0: i32, %arg1: i32) -> (i32, i32, i32) {
    %c0_i32 = arith.constant 0 : i32
    %c0_i32_0 = arith.constant 0 : i32
    return %arg0, %arg1, %c0_i32 : i32, i32, i32
  }
}

</mosaic_0001>

<bundles_post_ra>
// kernel: tpu_custom_call.1
= control target key start
LH: loop header
LB: loop body
LE: loop exit
PB: predicated region body
PF: predicated region fallthrough
CT: control target
= control target key end

     0   :  { %s2868_s0 = inlined_call_operand.vmem [shape: f32[2,8,32], index: 0, kind: input, shape index: {}]   ;;  %s2869_s1 = inlined_call_operand.vmem [shape: f32[2,8,32], index: 1, kind: input, shape index: {}]   ;;  %s2870_s2 = inlined_call_operand.vmem [shape: bf16[32,32], index: 2, kind: input, shape index: {}]   ;;  %s2871_s3 = inlined_call_operand.vmem [shape: f32[1,32], index: 3, kind: input, shape index: {}]   ;;  %s2872_s4 = inlined_call_operand.hbm [shape: bf16[32,32], index: 4, kind: input, shape index: {}]   ;;  %s2873_s5 = inlined_call_operand.vmem [shape: f32[1,32], index: 5, kind: input, shape index: {}]   ;;  %s2874_s6 = inlined_call_operand.hbm [shape: bf16[32,32], index: 6, kind: input, shape index: {}]   ;;  %s2875_s7 = inlined_call_operand.hbm [shape: f32[1,32], index: 7, kind: input, shape index: {}]   ;;  %s2876_s8 = inlined_call_operand.hbm [shape: bf16[32,32], index: 8, kind: input, shape index: {}]   ;;  %s2877_s9 = inlined_call_operand.hbm [shape: f32[1,32], index: 9, kind: input, shape index: {}]   ;;  %s2878_s10 = inlined_call_operand.vmem [shape: f32[1,32], index: 10, kind: input, shape index: {}]   ;;  %s2879_s11 = inlined_call_operand.vmem [shape: f32[1,32], index: 11, kind: input, shape index: {}]   ;;  %s2880_s12 = inlined_call_operand.vmem [shape: bf16[32,64], index: 12, kind: input, shape index: {}]   ;;  %s2881_s13 = inlined_call_operand.vmem [shape: f32[1,64], index: 13, kind: input, shape index: {}]   ;;  %s2882_s14 = inlined_call_operand.vmem [shape: bf16[64,32], index: 14, kind: input, shape index: {}]   ;;  %s2883_s15 = inlined_call_operand.vmem [shape: f32[1,32], index: 15, kind: input, shape index: {}]   ;;  %s2884_s16 = inlined_call_operand.vmem [shape: f32[1,32], index: 16, kind: input, shape index: {}]   ;;  %s2885_s17 = inlined_call_operand.vmem [shape: f32[1,32], index: 17, kind: input, shape index: {}]   ;;  %s2886_s18 = inlined_call_operand.hbm [shape: f32[2,8,32], index: 18, kind: output, shape index: {}]  }
   0x1   :  { %2903 = sst [smem:[#allocation26_spill]] %s2868_s0 }
   0x2   :  { %2904 = sst [smem:[#allocation27_spill]] %s2869_s1 }
   0x3   :  { %2905 = sst [smem:[#allocation28_spill]] %s2870_s2 }
   0x4   :  { %2906 = sst [smem:[#allocation29_spill]] %s2874_s6 }
   0x5   :  { %2907 = sst [smem:[#allocation30_spill]] %s2883_s15 }
   0x6   :  { %2908 = sst [smem:[#allocation31_spill]] %s2884_s16 }
   0x7   :  { %2909 = sst [smem:[#allocation32_spill]] %s2885_s17 }
   0x8   :  { %2910 = sst [smem:[#allocation33_spill]] %s2886_s18 }
   0x9   :  { %23 = vsyncpa [#allocation4], 0 }
   0xa   :  { %24 = vsyncpa [#allocation7], 0 }
   0xb   :  { %25 = vsyncpa [#allocation10], 0 }
   0xc   :  { %26 = vsyncpa [#allocation5], 0 }
   0xd   :  { %28 = vsyncpa [#allocation5 + $0x1], 0  ;;  %s2464_s27 = smov 0   ;;  %s2466_s28 = smov 0  }
   0xe   :  { %s2468_s29 = smov 0   ;;  %s2470_s30 = smov 0  }
   0xf   :  { %s2472_s0 = smov 0   ;;  %s2474_s19 = smov 0  }
  0x10 LB: > { %2911 = sst [smem:[#allocation17_spill]] %s2331_s27  ;;  %s1775_s1 = sadd.s32 4294967295, %s2351_s19   ;;  %s2351_s19 = sphi %s2474_s19, %s34_s19   ;;  %s2347_s0 = sphi %s2472_s0, %s2947_s0   ;;  %s2343_s30 = sphi %s2470_s30, %s2946_s30   ;;  %s2339_s29 = sphi %s2468_s29, %s2945_s29   ;;  %s2335_s28 = sphi %s2466_s28, %s2944_s28   ;;  %s2331_s27 = sphi %s2464_s27, %s2943_s27  }
  0x11   : > { %2912 = sst [smem:[#allocation18_spill]] %s2335_s28  ;;  %s1776_s20 = sadd.s32 4294967294, %s2351_s19  }
  0x12   : > { %2913 = sst [smem:[#allocation19_spill]] %s2339_s29  ;;  %s46_s21 = sadd.s32 1, %s2347_s0 }
  0x13   : > { %2914 = sst [smem:[#allocation20_spill]] %s2347_s0  ;;  %s445_s22 = sadd.s32 1, %s2339_s29 }
  0x14   : > { %2915 = sst [smem:[#allocation21_spill]] %s2351_s19  ;;  %p48_p0 = scmp.ge.s32.totalorder %s46_s21, 2 }
  0x15   : > { %p455_p1 = scmp.ne.s32.totalorder %s2339_s29, %s2335_s28  ;;  %p456_p2 = scmp.eq.s32.totalorder %s1775_s1, 1 }
  0x16   : > { %p461_p3 = scmp.ne.s32.totalorder %s2335_s28, %s2331_s27  ;;  %s2949_s21 = smov (%p48_p0, %s46_s21), 0 }
  0x17   : > { %2916 = sst [smem:[#allocation22_spill]] %s2949_s21  ;;  %p2504_p4 = por %p456_p2, %p455_p1 }
  0x18   : > { %p462_p5 = scmp.eq.s32.totalorder %s1776_s20, 1  ;;  %s440_s23 = ssub.s32 %s2347_s0, %s2949_s21 }
  0x19   : > { %s2917_s2 = scalar_select %p2504_p4, 1, 0 }
  0x1a   : > { %p1777_p6 = scmp.ge.s32.totalorder %s2351_s19, 1  ;;  %p443_p7 = scmp.eq.s32.totalorder %s440_s23, 0 }
  0x1b   : > { %2918 = sst [smem:[#allocation23_spill]] %s2917_s2  ;;  %p2511_p8 = por %p462_p5, %p461_p3 }
  0x1c   : > { %p469_p9 = scmp.lt.s32.totalorder %s2351_s19, 3  ;;  %p2523_p11 = scmp.eq.s32.totalorder %s1775_s1, 0 }
  0x1d   : > { %s2919_s24 = scalar_select %p2511_p8, 1, 0 }
  0x1e   : > { %s2517_s25 = scalar_select %p443_p7, %s2339_s29, %s445_s22  }
  0x1f   : > { %2920 = sst [smem:[#allocation24_spill]] %s2919_s24  ;;  %p2519_p10 = pnand %p1777_p6, %p469_p9 }
  0x20   : > { %2921 = sst [smem:[#allocation25_spill]] %s2517_s25  ;;  %s2353_s20 = smov [#allocation6]  }
  0x21   : > { %s2922_s26 = scalar_select %p2519_p10, 1, 0 }
  0x22   : > { %s2923_s27 = scalar_select %p2523_p11, 1, 0 }
  0x23   : > { %p1993_p12 = pneg %p2519_p10  ;;  %s503_s23 = sshll.u32 %s2353_s20, 4  ;;  %s504_s23 = int_to_ptr.vmem [resolvable:$true] %s503_s23 }
  0x24   : > { %s2354_s22 = smov [#allocation9]   ;;  %s2925_s6 = sld [smem:[#allocation29_spill]] }
  0x25   : > { %p2531_p13 = pnand %p2523_p11, %p1993_p12  ;;  %s527_s0 = sshll.u32 %s2354_s22, 4  ;;  %s2535_s0 = int_to_ptr.vmem [resolvable:$true] %s527_s0 }
  0x27   : > { %p2545_p1 = pneg %p2531_p13 }
  0x2a   : > { %s2121_s29 = scalar_lea.hbm %s2925_s6, 256 }
  0x2b   : > { %p2122_p0 = scmp.ne.s32.totalorder %s2925_s6, %s2121_s29  ;;  %p2128_p5 = scmp.lt.u32.totalorder %s2121_s29, %s2925_s6 }
  0x2d   : > { %p2124_p2 = pnand %p2545_p1, %p2122_p0 }
  0x2f   : > { %p2125_p3 = pneg %p2124_p2 }
  0x31   : > { %p2130_p6 = pnand %p2128_p5, %p2125_p3 }
  0x33   : > { %2133 = shalt.err (!%p2130_p6)
}
  0x34   : > { %s2134_s25 = scalar_lea.vmem %s504_s23, 256  ;;  %p2142_p8 = scmp.lt.s32.totalorder %s504_s23, %s504_s23 }
  0x35   : > { %p2135_p7 = scmp.ne.s32.totalorder %s504_s23, %s2134_s25  ;;  %p2143_p4 = scmp.lt.s32.totalorder %s2134_s25, %s2134_s25 }
  0x37   : > { %p2137_p9 = pnand %p2135_p7, %p2545_p1  ;;  %p2144_p11 = por %p2143_p4, %p2142_p8 }
  0x39   : > { %p2138_p12 = pneg %p2137_p9 }
  0x3b   : > { %p2145_p10 = pnand %p2144_p11, %p2138_p12 }
  0x3d   : > { %2148 = shalt.err (!%p2145_p10)
}
  0x3e   : > { %s2355_s19 = smov 64   ;;  %s2356_s24 = smov 4  }
  0x3f   : > { %1999 = dma.hbm_to_vmem [thread:$0]  (!%p2531_p13), %s2925_s6, 256, %s504_s23, [#allocation7], %s2355_s19, %s2355_s19, %s2356_s24  }
  0x40   : > { %s2149_s17 = scalar_lea.hbm %s2876_s8, 256 }
  0x41   : > { %p2150_p4 = scmp.ne.s32.totalorder %s2876_s8, %s2149_s17  ;;  %p2156_p11 = scmp.lt.u32.totalorder %s2149_s17, %s2876_s8 }
  0x43   : > { %p2152_p8 = pnand %p2150_p4, %p2545_p1 }
  0x45   : > { %p2153_p10 = pneg %p2152_p8 }
  0x47   : > { %p2158_p0 = pnand %p2156_p11, %p2153_p10 }
  0x49   : > { %2161 = shalt.err (!%p2158_p0)
}
  0x4a   : > { %s2162_s23 = scalar_lea.vmem %s2535_s0, 256  ;;  %p2170_p6 = scmp.lt.s32.totalorder %s2535_s0, %s2535_s0 }
  0x4b   : > { %p2163_p2 = scmp.ne.s32.totalorder %s2535_s0, %s2162_s23  ;;  %p2171_p7 = scmp.lt.s32.totalorder %s2162_s23, %s2162_s23 }
  0x4d   : > { %p2165_p3 = pnand %p2163_p2, %p2545_p1  ;;  %p2172_p9 = por %p2171_p7, %p2170_p6 }
  0x4f   : > { %p2166_p5 = pneg %p2165_p3 }
  0x51   : > { %p2173_p12 = pnand %p2172_p9, %p2166_p5 }
  0x53   : > { %2176 = shalt.err (!%p2173_p12)
}
  0x54   : > { %2005 = dma.hbm_to_vmem [thread:$0]  (!%p2531_p13), %s2876_s8, 256, %s2535_s0, [#allocation10], %s2355_s19, %s2355_s19, %s2356_s24  }
  0x55   : > { %s2357_s28 = smov [#allocation3]   ;;  %s2358_s18 = smov [#allocation8]  }
  0x56   : > { %s487_s2 = sshll.u32 %s2357_s28, 4  ;;  %s517_s29 = sshll.u32 %s2358_s18, 4  ;;  %s488_s2 = int_to_ptr.vmem [resolvable:$true] %s487_s2  ;;  %s518_s29 = int_to_ptr.vmem [resolvable:$true] %s517_s29 }
  0x57   : > { %s2177_s25 = scalar_lea.hbm %s2872_s4, 256 }
  0x58   : > { %p2178_p4 = scmp.ne.s32.totalorder %s2872_s4, %s2177_s25  ;;  %p2184_p11 = scmp.lt.u32.totalorder %s2177_s25, %s2872_s4 }
  0x5a   : > { %p2180_p8 = pnand %p2178_p4, %p2545_p1 }
  0x5c   : > { %p2181_p10 = pneg %p2180_p8 }
  0x5e   : > { %p2186_p0 = pnand %p2184_p11, %p2181_p10 }
  0x60   : > { %2189 = shalt.err (!%p2186_p0)
}
  0x61   : > { %s2190_s0 = scalar_lea.vmem %s488_s2, 256  ;;  %p2198_p6 = scmp.lt.s32.totalorder %s488_s2, %s488_s2 }
  0x62   : > { %p2191_p2 = scmp.ne.s32.totalorder %s488_s2, %s2190_s0  ;;  %p2199_p7 = scmp.lt.s32.totalorder %s2190_s0, %s2190_s0 }
  0x64   : > { %p2193_p3 = pnand %p2191_p2, %p2545_p1  ;;  %p2200_p9 = por %p2199_p7, %p2198_p6 }
  0x66   : > { %p2194_p5 = pneg %p2193_p3 }
  0x68   : > { %p2201_p12 = pnand %p2200_p9, %p2194_p5 }
  0x6a   : > { %2204 = shalt.err (!%p2201_p12)
}
  0x6b   : > { %1996 = dma.hbm_to_vmem [thread:$0]  (!%p2531_p13), %s2872_s4, 256, %s488_s2, [#allocation4], %s2355_s19, %s2355_s19, %s2356_s24  }
  0x6c   : > { %s2205_s18 = scalar_lea.hbm %s2875_s7, 16 }
  0x6d   : > { %p2206_p4 = scmp.ne.s32.totalorder %s2875_s7, %s2205_s18  ;;  %p2212_p11 = scmp.lt.u32.totalorder %s2205_s18, %s2875_s7 }
  0x6f   : > { %p2208_p8 = pnand %p2206_p4, %p2545_p1 }
  0x71   : > { %p2209_p10 = pneg %p2208_p8 }
  0x73   : > { %p2214_p0 = pnand %p2212_p11, %p2209_p10 }
  0x75   : > { %2217 = shalt.err (!%p2214_p0)
}
  0x76   : > { %s2218_s16 = scalar_lea.vmem %s518_s29, 16  ;;  %s2225_s19 = scalar_lea.vmem %s518_s29, 32 }
  0x77   : > { %p2219_p2 = scmp.ne.s32.totalorder %s518_s29, %s2218_s16  ;;  %p2226_p6 = scmp.lt.s32.totalorder %s518_s29, %s518_s29 }
  0x78   : > { %p2227_p7 = scmp.lt.s32.totalorder %s2225_s19, %s2218_s16 }
  0x79   : > { %p2221_p3 = pnand %p2219_p2, %p2545_p1 }
  0x7a   : > { %p2228_p9 = por %p2227_p7, %p2226_p6 }
  0x7b   : > { %p2222_p5 = pneg %p2221_p3 }
  0x7d   : > { %p2229_p12 = pnand %p2228_p9, %p2222_p5 }
  0x7f   : > { %2232 = shalt.err (!%p2229_p12)
}
  0x80   : > { %2002 = dma.hbm_to_vmem [thread:$0]  (!%p2531_p13), %s2875_s7, 16, %s518_s29, [#allocation7]  }
  0x81   : > { %s2359_s0 = smov [#allocation11]   ;;  %s2233_s28 = scalar_lea.hbm %s2877_s9, 16 }
  0x82   : > { %s541_s6 = sshll.u32 %s2359_s0, 4  ;;  %p2234_p4 = scmp.ne.s32.totalorder %s2877_s9, %s2233_s28  ;;  %s542_s6 = int_to_ptr.vmem [resolvable:$true] %s541_s6 }
  0x83   : > { %p2240_p11 = scmp.lt.u32.totalorder %s2233_s28, %s2877_s9 }
  0x84   : > { %p2236_p8 = pnand %p2234_p4, %p2545_p1 }
  0x86   : > { %p2237_p10 = pneg %p2236_p8 }
  0x88   : > { %p2242_p0 = pnand %p2240_p11, %p2237_p10 }
  0x8a   : > { %2245 = shalt.err (!%p2242_p0)
}
  0x8b   : > { %s2246_s29 = scalar_lea.vmem %s542_s6, 16  ;;  %s2253_s23 = scalar_lea.vmem %s542_s6, 32 }
  0x8c   : > { %p2247_p2 = scmp.ne.s32.totalorder %s542_s6, %s2246_s29  ;;  %p2254_p6 = scmp.lt.s32.totalorder %s542_s6, %s542_s6 }
  0x8d   : > { %p2255_p7 = scmp.lt.s32.totalorder %s2253_s23, %s2246_s29 }
  0x8e   : > { %p2249_p3 = pnand %p2247_p2, %p2545_p1 }
  0x8f   : > { %p2256_p9 = por %p2255_p7, %p2254_p6 }
  0x90   : > { %p2250_p5 = pneg %p2249_p3 }
  0x92   : > { %p2257_p12 = pnand %p2256_p9, %p2250_p5 }
  0x94   : > { %2260 = shalt.err (!%p2257_p12)
}
  0x95   : > { %2008 = dma.hbm_to_vmem [thread:$0]  (!%p2531_p13), %s2877_s9, 16, %s542_s6, [#allocation10]  }
  0x96   : > { %p2927_p4 = scmp.ne.s32.totalorder %s2922_s26, 0 }
  0x97   : > { %p2928_p8 = scmp.ne.s32.totalorder (!%p2927_p4), %s2923_s27, 0 }
  0x98   : > { %595 = sbr.rel (%p2927_p4) target bundleno = 2688 (0xa80), region = 92 }
  0x9f   : > { %2314 = dma.done.wait (%p2928_p8), [#allocation4], 256  }
  0xa0   : > { %2316 = vsyncadd (%p2928_p8), [#allocation4], 4294967040 }
  0xa1   : > { %2318 = dma.done.wait (%p2928_p8), [#allocation7], 272  }
  0xa2   : > { %2320 = vsyncadd (%p2928_p8), [#allocation7], 4294967024 }
  0xa3   : > { %2322 = dma.done.wait (%p2928_p8), [#allocation10], 272  }
  0xa4   : > { %2324 = vsyncadd (%p2928_p8), [#allocation10], 4294967024  ;;  %p671_p13 = scmp.lt.s32.totalorder %s2343_s30, 1  ;;  %v2360_v0 = vmov 0.0   ;;  %vm2361_vm0 = vmmov 0   ;;  %v2087_v1 = vld [vmem:[#allocation3] sm:$0xff]  }
  0xa5   : > { %1879 = vmatprep.subr.bf16.mxu1 %v2360_v0  ;;  %1871 = vmatprep.subr.bf16.mxu0 %v2360_v0  ;;  %s2929_s24 = sld [smem:[#allocation28_spill]]  ;;  %s2930_s6 = sld [smem:[#allocation27_spill]]  ;;  %v2089_v3 = vld [vmem:[#allocation3 + $0x8] sm:$0xff]   ;;  %vm710_vm1 = vcmask 261120   ;;  %v1797_v9 = vld [vmem:[%s2873_s5] ss:$0 sm:$0xff] }
  0xa6   : > { %1883 = vmatprep.mubr.msk.bf16.mxu1 %vm2361_vm0, %v2360_v0  ;;  %s672_s21 = scalar_select %p671_p13, %s2343_s30, 1  ;;  %1875 = vmatprep.mubr.msk.bf16.mxu0 %vm2361_vm0, %v2360_v0  ;;  %v1793_v10 = vld [vmem:[%s2871_s3] ss:$0 sm:$0xff]  ;;  %vm887_vm2 = vcmask 64512   ;;  %v2091_v25 = vld [vmem:[#allocation6] sm:$0xff]   ;;  %vm949_vm3 = vcmask 1043456  }
  0xa7   : > { %s2931_s18 = sld [smem:[#allocation26_spill]]  ;;  %1880 = vmatpush3.bf16.msra.mxu1 %v2087_v1  ;;  %s2364_s27 = smov 104   ;;  %v2092_v26 = vld [vmem:[#allocation6 + $0x8] sm:$0xff]   ;;  %v1801_v41 = vld [vmem:[#allocation8] ss:$0 sm:$0xff]  ;;  %vm1111_vm4 = vcmask 130112  }
  0xa8   : > { %s1791_s26 = sshll.u32 %s672_s21, 3  ;;  %1881 = vmatprep.subr.bf16.mxu1 %v2360_v0  ;;  %s2362_s21 = smov 112   ;;  %vm1227_vm5 = vcmask 195712   ;;  %vm1343_vm6 = vcmask 261312   ;;  %vm1552_vm7 = vcmask 523264  }
  0xa9   : > { %s2365_s20 = smov 8   ;;  %s2366_s2 = smov 16  }
  0xaa   : > { %s2367_s0 = smov 24   ;;  %s2932_s17 = sld [smem:[#allocation30_spill]] }
  0xab   : > { %v2088_v2 = vld [vmem:[%s2929_s24] sm:$0xff]   ;;  %s681_s15 = scalar_lea.vmem %s2930_s6, %s1791_s26  ;;  %v2090_v4 = vld [vmem:[%s2929_s24 + $0x8] sm:$0xff]   ;;  %1882 = vmatpush3.bf16.msra.mxu1 %v2089_v3  ;;  %s2933_s28 = sld [smem:[#allocation18_spill]] }
  0xac   : > { %1872 = vmatpush3.bf16.msra.mxu0 %v2088_v2  ;;  %v684_v5 = vld [vmem:[%s681_s15] sm:$0xff]  ;;  %1895 = vmatprep.subr.bf16.mxu1 %v2360_v0  ;;  %s2934_s22 = sld [smem:[#allocation23_spill]]  ;;  %s2935_s23 = sld [smem:[#allocation31_spill]] }
  0xad   : > { %s677_s1 = scalar_lea.vmem %s2931_s18, %s1791_s26  ;;  %1873 = vmatprep.subr.bf16.mxu0 %v2360_v0  ;;  %v686_v7 = vpack.c.bf16 %v684_v5, %v684_v5  ;;  %s2363_s26 = smov 120  }
  0xae   : > { %v2683_v6 = vld [vmem:[%s677_s1] sm:$0xff]  ;;  %s2937_s6 = sld [smem:[#allocation33_spill]] }
  0xaf   : > { %v685_v8 = vpack.c.bf16 %v2683_v6, %v2683_v6  ;;  %1884 = vmatmul.mubr.msk.bf16.vlgmr.msra.gmra.mrb[0].mxu1 %vm710_vm1, %v686_v7 }
  0xb0   : > { %1874 = vmatpush3.bf16.msra.mxu0 %v2090_v4  ;;  %1897 = vmatprep.mubr.msk.bf16.mxu1 %vm2361_vm0, %v2360_v0 }
  0xb1   : > { %1887 = vmatprep.subr.bf16.mxu0 %v2360_v0  ;;  %s668_s18 = sand.u32 1, %s2933_s28  }
  0xb2   : > { %s1790_s1 = sshll.u32 %s668_s18, 3  ;;  %p2938_p10 = scmp.ne.s32.totalorder %s2934_s22, 0 }
  0xb3   : > { %1876 = vmatmul.mubr.msk.bf16.vlgmr.msra.gmra.mrb[0].mxu0 %vm710_vm1, %v685_v8 }
  0xb4   : > { %1891 = vmatprep.mubr.msk.bf16.mxu0 %vm2361_vm0, %v2360_v0  ;;  %1888 = vmatpush3.bf16.msra.mxu0 %v2091_v25 }
  0xb5   : > { %1889 = vmatprep.subr.bf16.mxu0 %v2360_v0 }
  0xb8   : > { %1890 = vmatpush3.bf16.msra.mxu0 %v2092_v26 }
  0xb9   : > { %1901 = vmatprep.subr.bf16.mxu0 %v2360_v0 }
  0xbb   : > { %1892 = vmatmul.mubr.msk.bf16.vlgmr.msra.gmra.mrb[4].mxu0 %vm710_vm1, %v686_v7 }
  0xbc   : > { %1903 = vmatprep.mubr.msk.bf16.mxu0 %vm2361_vm0, %v2360_v0 }
 0x182   : > { %v814_v11 = vpop.f32.mrb[0].mxu1 }
 0x183   : > { %v815_v12 = vadd.f32 %v1797_v9, %v814_v11  ;;  %v1885_v13 = vpop.f32.mrb[1].mxu1 }
 0x184   : > { %v817_v16 = vpop.f32.mrb[2].mxu1 }
 0x185   : > { %v885_v18 = vpack.c.bf16 %v815_v12, %v815_v12  ;;  %v1886_v19 = vpop.f32.mrb[3].mxu1 }
 0x186   : > { %v748_v14 = vpop.f32.mrb[0].mxu0 }
 0x187   : > { %v749_v15 = vadd.f32 %v1793_v10, %v748_v14  ;;  %v1877_v17 = vpop.f32.mrb[1].mxu0  ;;  %1115 = vrot.lane.b32.xlu1 %v885_v18, %s2362_s21  ;;  %998 = vrot.lane.b32.xlu0 %v885_v18, %s2363_s26  ;;  %v892_v23 = vsel %vm887_vm2, %v885_v18, 0 }
 0x188   : > { %v751_v20 = vpop.f32.mrb[2].mxu0  ;;  %1896 = vmatpush3.bf16.xpose.msra.mxu1 %v892_v23 }
 0x189   : > { %v883_v21 = vmul.f32 0.35355338, %v749_v15  ;;  %v1878_v22 = vpop.f32.mrb[3].mxu0  ;;  %1907 = vmatprep.subr.bf16.mxu1 %v2360_v0 }
 0x18b   : > { %v884_v24 = vpack.c.bf16 %v883_v21, %v883_v21 }
 0x18d   : > { %1113 = vrot.lane.b32.xlu1 %v884_v24, %s2362_s21  ;;  %995 = vrot.lane.b32.xlu0 %v884_v24, %s2363_s26 }
 0x18e   : > { %v877_v42 = vpop.f32.mrb[4].mxu0 }
 0x18f   : > { %1898 = vmatmul.mubr.msk.bf16.vlgmr.msra.gmra.mrb[4].mxu1 %vm887_vm2, %v884_v24  ;;  %v878_v43 = vadd.f32 %v1801_v41, %v877_v42  ;;  %v1893_v44 = vpop.f32.mrb[5].mxu0 }
 0x190   : > { %1909 = vmatprep.mubr.msk.bf16.mxu1 %vm2361_vm0, %v2360_v0  ;;  %v880_v45 = vpop.f32.mrb[6].mxu0 }
 0x191   : > { %1229 = vrot.lane.b32.xlu1 %v884_v24, %s2364_s27  ;;  %1231 = vrot.lane.b32.xlu0 %v885_v18, %s2364_s27  ;;  %v886_v46 = vpack.c.bf16 %v878_v43, %v878_v43  ;;  %v1894_v47 = vpop.f32.mrb[7].mxu0 }
 0x193   : > { %v951_v48 = vsel %vm949_vm3, %v886_v46, 0 }
 0x194   : > { %1902 = vmatpush3.bf16.msra.mxu0 %v951_v48 }
 0x195   : > { %1913 = vmatprep.subr.bf16.mxu0 %v2360_v0 }
 0x1f9   : > { %v999_v27 = vpop.permute.xlu0 %998  ;;  %v1116_v29 = vpop.permute.xlu1 %1115 }
 0x1fa   : > { %v1004_v28 = vsel %vm887_vm2, %v999_v27, 0  ;;  %v1121_v31 = vsel %vm887_vm2, %v1116_v29, 0 }
 0x1fb   : > { %1908 = vmatpush3.bf16.xpose.msra.mxu1 %v1004_v28 }
 0x1fc   : > { %1919 = vmatprep.subr.bf16.mxu1 %v2360_v0 }
 0x1ff   : > { %v996_v30 = vpop.permute.xlu0 %995  ;;  %v1114_v33 = vpop.permute.xlu1 %1113 }
 0x202   : > { %1910 = vmatmul.mubr.msk.bf16.vlgmr.msra.gmra.mrb[8].mxu1 %vm887_vm2, %v996_v30 }
 0x203   : > { %1920 = vmatpush3.bf16.xpose.msra.mxu1 %v1121_v31  ;;  %1921 = vmatprep.mubr.msk.bf16.mxu1 %vm2361_vm0, %v2360_v0  ;;  %v1232_v32 = vpop.permute.xlu0 %1231  ;;  %v1230_v35 = vpop.permute.xlu1 %1229 }
 0x204   : > { %1931 = vmatprep.subr.bf16.mxu1 %v2360_v0  ;;  %v1237_v34 = vsel %vm887_vm2, %v1232_v32, 0 }
 0x20a   : > { %1922 = vmatmul.mubr.msk.bf16.vlgmr.msra.gmra.mrb[12].mxu1 %vm887_vm2, %v1114_v33 }
 0x20b   : > { %1932 = vmatpush3.bf16.xpose.msra.mxu1 %v1237_v34  ;;  %1933 = vmatprep.mubr.msk.bf16.mxu1 %vm2361_vm0, %v2360_v0 }
 0x20c   : > { %1943 = vmatprep.subr.bf16.mxu1 %v2360_v0 }
 0x212   : > { %1934 = vmatmul.mubr.msk.bf16.vlgmr.msra.gmra.mrb[16].mxu1 %vm887_vm2, %v1230_v35 }
 0x213   : > { %1947 = vmatprep.mubr.msk.bf16.mxu1 %vm2361_vm0, %v2360_v0 }
 0x262   : > { %v928_v36 = vpop.f32.mrb[4].mxu1 }
 0x263   : > { %v1899_v37 = vpop.f32.mrb[5].mxu1  ;;  %v934_v38 = vsel %vm887_vm2, %v928_v36, -inf }
 0x264   : > { %935 = vmax.xlane.f32.xlu0 %v934_v38  ;;  %v931_v39 = vpop.f32.mrb[6].mxu1 }
 0x265   : > { %v1900_v40 = vpop.f32.mrb[7].mxu1 }
 0x2d5   : > { %v1040_v49 = vpop.f32.mrb[8].mxu1 }
 0x2d6   : > { %v1911_v50 = vpop.f32.mrb[9].mxu1  ;;  %v1046_v51 = vsel %vm887_vm2, %v1040_v49, -inf }
 0x2d7   : > { %1047 = vmax.xlane.f32.xlu1 %v1046_v51  ;;  %v1043_v52 = vpop.f32.mrb[10].mxu1 }
 0x2d8   : > { %v1912_v53 = vpop.f32.mrb[11].mxu1  ;;  %v2093_v52 = vld [vmem:[#allocation9] sm:$0xff]  }
 0x2d9   : > { %1944 = vmatpush3.bf16.msra.mxu1 %v2093_v52  ;;  %v2094_v53 = vld [vmem:[#allocation9 + $0x8] sm:$0xff]  }
 0x2da   : > { %1945 = vmatprep.subr.bf16.mxu1 %v2360_v0 }
 0x2dd   : > { %v1157_v54 = vpop.f32.mrb[12].mxu1  ;;  %1946 = vmatpush3.bf16.msra.mxu1 %v2094_v53 }
 0x2de   : > { %v1923_v55 = vpop.f32.mrb[13].mxu1  ;;  %v1163_v56 = vsel %vm887_vm2, %v1157_v54, -inf  ;;  %1959 = vmatprep.subr.bf16.mxu1 %v2360_v0 }
 0x2df   : > { %1164 = vmax.xlane.f32.xlu0 %v1163_v56  ;;  %v1160_v57 = vpop.f32.mrb[14].mxu1 }
 0x2e0   : > { %v1924_v58 = vpop.f32.mrb[15].mxu1 }
 0x2e5   : > { %v1273_v59 = vpop.f32.mrb[16].mxu1 }
 0x2e6   : > { %v1935_v60 = vpop.f32.mrb[17].mxu1  ;;  %v1279_v61 = vsel %vm887_vm2, %v1273_v59, -inf }
 0x2e7   : > { %1280 = vmax.xlane.f32.xlu0 %v1279_v61  ;;  %v1276_v62 = vpop.f32.mrb[18].mxu1 }
 0x2e8   : > { %v1936_v63 = vpop.f32.mrb[19].mxu1 }
 0x2f1   : > { %v936_v1 = vpop.xlane.xlu0 %935 }
 0x2f2   : > { %v937_v2 = vsub.f32 %v928_v36, %v936_v1 }
 0x2f4   : > { %v938_v3 = vmul.f32 1.442695, %v937_v2 }
 0x2f6   : > { %2101 = vpow2.f32 %v938_v3 }
 0x300   : > { %v2102_v4 = vpop.eup %2101 }
 0x301   : > { %v940_v5 = vsel %vm887_vm2, %v2102_v4, 0.0 }
 0x302   : > { %941 = vadd.xlane.f32.xlu1 %v940_v5 }
 0x313   : > { %1059 = vrot.lane.b32.xlu1 %v886_v46, %s2363_s26  ;;  %s1832_s26 = sshll.u32 %s2343_s30, 7  ;;  %s2368_s30 = smov [#allocation12]  }
 0x314   : > { %s2820_s15 = scalar_lea.hbm %s2937_s6, %s1832_s26 }
 0x364   : > { %v1048_v7 = vpop.xlane.xlu1 %1047 }
 0x365   : > { %v1049_v8 = vsub.f32 %v1040_v49, %v1048_v7 }
 0x367   : > { %v1050_v9 = vmul.f32 1.442695, %v1049_v8 }
 0x369   : > { %2103 = vpow2.f32 %v1050_v9 }
 0x36c   : > { %v1165_v10 = vpop.xlane.xlu0 %1164 }
 0x36d   : > { %v1166_v11 = vsub.f32 %v1157_v54, %v1165_v10 }
 0x36f   : > { %v1167_v12 = vmul.f32 1.442695, %v1166_v11 }
 0x371   : > { %2105 = vpow2.f32 %v1167_v12 }
 0x373   : > { %v2104_v13 = vpop.eup %2103 }
 0x374   : > { %v1281_v14 = vpop.xlane.xlu0 %1280  ;;  %v1052_v15 = vsel %vm887_vm2, %v2104_v13, 0.0 }
 0x375   : > { %v1282_v16 = vsub.f32 %v1273_v59, %v1281_v14  ;;  %1053 = vadd.xlane.f32.xlu0 %v1052_v15 }
 0x377   : > { %v1283_v17 = vmul.f32 1.442695, %v1282_v16 }
 0x379   : > { %2107 = vpow2.f32 %v1283_v17 }
 0x37b   : > { %v2106_v18 = vpop.eup %2105 }
 0x37c   : > { %v1169_v19 = vsel %vm887_vm2, %v2106_v18, 0.0 }
 0x37d   : > { %1170 = vadd.xlane.f32.xlu1 %v1169_v19  ;;  %v2096_v19 = vld [vmem:[%s2880_s12 + $0x8] sm:$0xff]  }
 0x383   : > { %v2108_v20 = vpop.eup %2107 }
 0x384   : > { %v1285_v21 = vsel %vm887_vm2, %v2108_v20, 0.0 }
 0x385   : > { %1286 = vadd.xlane.f32.xlu0 %v1285_v21 }
 0x38e   : > { %1291 = vrot.lane.b32.xlu1 %v886_v46, %s2364_s27  ;;  %s670_s27 = scalar_lea.vmem [#allocation12], %s1790_s1  ;;  %s2265_s1 = sshll.u32 %s2368_s30, 4  ;;  %s2266_s1 = int_to_ptr.vmem [resolvable:$false] %s2265_s1 }
 0x38f   : > { %v942_v22 = vpop.xlane.xlu1 %941  ;;  %s2267_s25 = scalar_lea.vmem %s2266_s1, 256 }
 0x390   : > { %2109 = vrcp.f32 %v942_v22 }
 0x393   : > { %v1060_v24 = vpop.permute.xlu1 %1059 }
 0x394   : > { %v1065_v27 = vsel %vm949_vm3, %v1060_v24, 0 }
 0x39a   : > { %v2110_v23 = vpop.eup %2109 }
 0x39b   : > { %1175 = vrot.lane.b32.xlu0 %v886_v46, %s2362_s21  ;;  %v944_v25 = vmul.f32 %v2110_v23, %v2102_v4  ;;  %v1813_v4 = vld [vmem:[#allocation11] ss:$0 sm:$0xff]  ;;  %s2936_s21 = sld [smem:[#allocation32_spill]] }
 0x39d   : > { %v945_v26 = vpack.c.bf16 %v944_v25, %v944_v25  ;;  %v1817_v25 = vld [vmem:[%s2878_s10] ss:$0 sm:$0xff] }
 0x39f   : > { %1904 = vmatmul.mubr.msk.bf16.vlgmr.msra.gmra.mrb[8].mxu0 %vm887_vm2, %v945_v26 }
 0x3a0   : > { %1914 = vmatpush3.bf16.msra.mxu0 %v1065_v27  ;;  %1915 = vmatprep.mubr.msk.bf16.mxu0 %vm2361_vm0, %v2360_v0  ;;  %v1818_v27 = vld [vmem:[%s2879_s11] ss:$0 sm:$0xff] }
 0x3a1   : > { %1925 = vmatprep.subr.bf16.mxu0 %v2360_v0 }
 0x402   : > { %v1054_v28 = vpop.xlane.xlu0 %1053 }
 0x403   : > { %2111 = vrcp.f32 %v1054_v28 }
 0x40a   : > { %v1171_v29 = vpop.xlane.xlu1 %1170 }
 0x40b   : > { %2113 = vrcp.f32 %v1171_v29 }
 0x40d   : > { %v2112_v30 = vpop.eup %2111 }
 0x40e   : > { %v1056_v31 = vmul.f32 %v2112_v30, %v2104_v13  ;;  %v1292_v38 = vpop.permute.xlu1 %1291 }
 0x40f   : > { %v1297_v40 = vsel %vm949_vm3, %v1292_v38, 0 }
 0x410   : > { %v1057_v32 = vpack.c.bf16 %v1056_v31, %v1056_v31  ;;  %v2099_v31 = vld [vmem:[%s2882_s14 + $0x10] sm:$0xff]  }
 0x412   : > { %v1287_v33 = vpop.xlane.xlu0 %1286  ;;  %1916 = vmatmul.mubr.msk.bf16.vlgmr.msra.gmra.mrb[12].mxu0 %vm887_vm2, %v1057_v32  ;;  %v2100_v32 = vld [vmem:[%s2882_s14 + $0x18] sm:$0xff]  }
 0x413   : > { %2115 = vrcp.f32 %v1287_v33  ;;  %1927 = vmatprep.mubr.msk.bf16.mxu0 %vm2361_vm0, %v2360_v0  ;;  %v1819_v33 = vld [vmem:[%s2881_s13] ss:$0 sm:$0xff] }
 0x415   : > { %v2114_v34 = vpop.eup %2113 }
 0x416   : > { %v1173_v35 = vmul.f32 %v2114_v34, %v2106_v18  ;;  %v1176_v36 = vpop.permute.xlu0 %1175  ;;  %v2095_v18 = vld [vmem:[%s2880_s12] sm:$0xff]  }
 0x417   : > { %v1181_v37 = vsel %vm949_vm3, %v1176_v36, 0 }
 0x418   : > { %1926 = vmatpush3.bf16.msra.mxu0 %v1181_v37  ;;  %v1174_v39 = vpack.c.bf16 %v1173_v35, %v1173_v35 }
 0x419   : > { %1937 = vmatprep.subr.bf16.mxu0 %v2360_v0 }
 0x41b   : > { %1928 = vmatmul.mubr.msk.bf16.vlgmr.msra.gmra.mrb[16].mxu0 %vm887_vm2, %v1174_v39 }
 0x41c   : > { %1938 = vmatpush3.bf16.msra.mxu0 %v1297_v40  ;;  %1939 = vmatprep.mubr.msk.bf16.mxu0 %vm2361_vm0, %v2360_v0 }
 0x41d   : > { %v2116_v41 = vpop.eup %2115  ;;  %1951 = vmatprep.subr.bf16.mxu0 %v2360_v0 }
 0x41e   : > { %v1289_v42 = vmul.f32 %v2116_v41, %v2108_v20  ;;  %v2098_v20 = vld [vmem:[%s2882_s14 + $0x8] sm:$0xff]  }
 0x420   : > { %v1290_v43 = vpack.c.bf16 %v1289_v42, %v1289_v42 }
 0x423   : > { %1940 = vmatmul.mubr.msk.bf16.vlgmr.msra.gmra.mrb[20].mxu0 %vm887_vm2, %v1290_v43 }
 0x424   : > { %1955 = vmatprep.mubr.msk.bf16.mxu0 %vm2361_vm0, %v2360_v0  ;;  %1952 = vmatpush3.bf16.msra.mxu0 %v2095_v18 }
 0x425   : > { %1953 = vmatprep.subr.bf16.mxu0 %v2360_v0 }
 0x428   : > { %1954 = vmatpush3.bf16.msra.mxu0 %v2096_v19 }
 0x472   : > { %v987_v44 = vpop.f32.mrb[8].mxu0 }
 0x473   : > { %993 = vst.msk [vmem:[#allocation2] sm:$0xff] %vm887_vm2, %v987_v44  ;;  %v1905_v45 = vpop.f32.mrb[9].mxu0 }
 0x474   : > { %v990_v46 = vpop.f32.mrb[10].mxu0 }
 0x475   : > { %v1906_v47 = vpop.f32.mrb[11].mxu0 }
 0x4e5   : > { %v1101_v48 = vpop.f32.mrb[12].mxu0 }
 0x4e6   : > { %1108 = vrot.lane.b32.xlu1 %v1101_v48, %s2365_s20  ;;  %v1917_v49 = vpop.f32.mrb[13].mxu0  ;;  %s1642_s20 = sshll.u32 %s670_s27, 4  ;;  %s2822_s20 = int_to_ptr.vmem [resolvable:$true] %s1642_s20 }
 0x4e7   : > { %v1104_v50 = vpop.f32.mrb[14].mxu0  ;;  %s2261_s28 = scalar_lea.vmem %s2822_s20, 128  ;;  %p2268_p2 = scmp.lt.s32.totalorder %s2822_s20, %s2266_s1 }
 0x4e8   : > { %v1918_v51 = vpop.f32.mrb[15].mxu0  ;;  %p2262_p1 = scmp.ne.s32.totalorder %s2822_s20, %s2261_s28  ;;  %p2269_p3 = scmp.lt.s32.totalorder %s2267_s25, %s2261_s28 }
 0x4ea   : > { %p2263_p11 = pnand %p2262_p1, %p2938_p10  ;;  %p2270_p5 = por %p2269_p3, %p2268_p2 }
 0x4ec   : > { %p2264_p0 = pneg %p2263_p11 }
 0x4ee   : > { %v1217_v54 = vpop.f32.mrb[16].mxu0  ;;  %p2271_p6 = pnand %p2270_p5, %p2264_p0 }
 0x4ef   : > { %1224 = vrot.lane.b32.xlu0 %v1217_v54, %s2366_s2  ;;  %v1929_v55 = vpop.f32.mrb[17].mxu0 }
 0x4f0   : > { %v1220_v56 = vpop.f32.mrb[18].mxu0 }
 0x4f1   : > { %v1930_v57 = vpop.f32.mrb[19].mxu0 }
 0x4f2   : > { %v1829_v57 = vld [vmem:[%s2935_s23] ss:$0 sm:$0xff] }
 0x4f6   : > { %v1333_v58 = vpop.f32.mrb[20].mxu0 }
 0x4f7   : > { %1340 = vrot.lane.b32.xlu1 %v1333_v58, %s2367_s0  ;;  %v1941_v59 = vpop.f32.mrb[21].mxu0 }
 0x4f8   : > { %v1336_v60 = vpop.f32.mrb[22].mxu0  ;;  %v1830_v59 = vld [vmem:[%s2936_s21] ss:$0 sm:$0xff] }
 0x4f9   : > { %v1942_v61 = vpop.f32.mrb[23].mxu0 }
 0x558   : > { %v1109_v62 = vpop.permute.xlu1 %1108 }
 0x559   : > { %1112 = vst.msk [vmem:[#allocation2] sm:$0xff] %vm1111_vm4, %v1109_v62 }
 0x561   : > { %v1225_v63 = vpop.permute.xlu0 %1224 }
 0x562   : > { %1228 = vst.msk [vmem:[#allocation2] sm:$0xff] %vm1227_vm5, %v1225_v63 }
 0x569   : > { %v1341_v1 = vpop.permute.xlu1 %1340 }
 0x56a   : > { %1344 = vst.msk [vmem:[#allocation2] sm:$0xff] %vm1343_vm6, %v1341_v1 }
 0x571   : > { %v1345_v2 = vld [vmem:[#allocation2] sm:$0xff] }
 0x572   : > { %v1346_v3 = vpack.c.bf16 %v1345_v2, %v1345_v2 }
 0x574   : > { %1948 = vmatmul.mubr.msk.bf16.vlgmr.msra.gmra.mrb[20].mxu1 %vm710_vm1, %v1346_v3 }
 0x575   : > { %1967 = vmatprep.mubr.msk.bf16.mxu1 %vm2361_vm0, %v2360_v0 }
 0x647   : > { %v1407_v5 = vpop.f32.mrb[20].mxu1 }
 0x648   : > { %v1408_v7 = vadd.f32 %v1813_v4, %v1407_v5  ;;  %v1949_v8 = vpop.f32.mrb[21].mxu1 }
 0x649   : > { %v1410_v9 = vpop.f32.mrb[22].mxu1 }
 0x64a   : > { %v1950_v10 = vpop.f32.mrb[23].mxu1  ;;  %v1413_v11 = vadd.f32 %v1408_v7, %v2683_v6  ;;  %v2097_v6 = vld [vmem:[%s2882_s14] sm:$0xff]  }
 0x64b   : > { %1960 = vmatpush3.bf16.msra.mxu1 %v2097_v6 }
 0x64c   : > { %v1416_v12 = vsel %vm710_vm1, %v1413_v11, 0.0  ;;  %1961 = vmatprep.subr.bf16.mxu1 %v2360_v0 }
 0x64d   : > { %1417 = vadd.xlane.f32.xlu0 %v1416_v12 }
 0x64f   : > { %1962 = vmatpush3.bf16.msra.mxu1 %v2098_v20 }
 0x650   : > { %1963 = vmatprep.subr.bf16.mxu1 %v2360_v0 }
 0x653   : > { %1964 = vmatpush3.bf16.msra.mxu1 %v2099_v31 }
 0x654   : > { %1965 = vmatprep.subr.bf16.mxu1 %v2360_v0  ;;  %v1823_v0 = vld [vmem:[%s2932_s17] ss:$0 sm:$0xff]  ;;  %s1628_s17 = scalar_lea.sflag [#allocation5], %s668_s18 }
 0x657   : > { %1966 = vmatpush3.bf16.msra.mxu1 %v2100_v32 }
 0x6da   : > { %v1418_v13 = vpop.xlane.xlu0 %1417 }
 0x6db   : > { %v1420_v14 = vmul.f32 0.03125, %v1418_v13 }
 0x6dd   : > { %v1421_v15 = vsub.f32 %v1413_v11, %v1420_v14 }
 0x6df   : > { %v1422_v16 = vmul.f32 %v1421_v15, %v1421_v15 }
 0x6e1   : > { %v1423_v17 = vsel %vm710_vm1, %v1422_v16, 0.0 }
 0x6e2   : > { %1424 = vadd.xlane.f32.xlu1 %v1423_v17 }
 0x76f   : > { %v1425_v21 = vpop.xlane.xlu1 %1424 }
 0x770   : > { %v1426_v22 = vmul.f32 0.03125, %v1425_v21 }
 0x772   : > { %v1427_v23 = vadd.f32 1e-06, %v1426_v22 }
 0x774   : > { %2117 = vrsqrt.f32 %v1427_v23 }
 0x77e   : > { %v2118_v24 = vpop.eup %2117 }
 0x77f   : > { %v1429_v26 = vmul.f32 %v2118_v24, %v1421_v15 }
 0x781   : > { %v1436_v28 = vmul.f32 %v1817_v25, %v1429_v26 }
 0x783   : > { %v1443_v29 = vadd.f32 %v1818_v27, %v1436_v28 }
 0x785   : > { %v1444_v30 = vpack.c.bf16 %v1443_v29, %v1443_v29 }
 0x787   : > { %1956 = vmatmul.mubr.msk.bf16.vlgmr.msra.gmra.mrb[24].mxu0 %vm710_vm1, %v1444_v30 }
 0x85a   : > { %v1505_v34 = vpop.f32.mrb[24].mxu0 }
 0x85b   : > { %v1506_v35 = vadd.f32 %v1819_v33, %v1505_v34  ;;  %v1957_v36 = vpop.f32.mrb[25].mxu0 }
 0x85c   : > { %v1508_v37 = vpop.f32.mrb[26].mxu0 }
 0x85d   : > { %v1511_v38 = vmax.f32 %v1506_v35, 0.0  ;;  %v1958_v39 = vpop.f32.mrb[27].mxu0 }
 0x85f   : > { %v1512_v40 = vpack.c.bf16 %v1511_v38, %v1511_v38 }
 0x861   : > { %1968 = vmatmul.mubr.msk.bf16.vlgmr.msra.gmra.mrb[24].mxu1 %vm1552_vm7, %v1512_v40 }
 0x934   : > { %v1590_v41 = vpop.f32.mrb[24].mxu1 }
 0x935   : > { %v1591_v42 = vadd.f32 %v1823_v0, %v1590_v41  ;;  %v1969_v43 = vpop.f32.mrb[25].mxu1 }
 0x936   : > { %v1593_v44 = vpop.f32.mrb[26].mxu1 }
 0x937   : > { %v1970_v45 = vpop.f32.mrb[27].mxu1  ;;  %v1596_v46 = vadd.f32 %v1591_v42, %v1443_v29 }
 0x939   : > { %v1599_v47 = vsel %vm710_vm1, %v1596_v46, 0.0 }
 0x93a   : > { %1600 = vadd.xlane.f32.xlu0 %v1599_v47 }
 0x9c7   : > { %v1601_v48 = vpop.xlane.xlu0 %1600 }
 0x9c8   : > { %v1602_v49 = vmul.f32 0.03125, %v1601_v48 }
 0x9ca   : > { %v1603_v50 = vsub.f32 %v1596_v46, %v1602_v49 }
 0x9cc   : > { %v1604_v51 = vmul.f32 %v1603_v50, %v1603_v50 }
 0x9ce   : > { %v1605_v52 = vsel %vm710_vm1, %v1604_v51, 0.0 }
 0x9cf   : > { %1606 = vadd.xlane.f32.xlu0 %v1605_v52 }
 0xa5c   : > { %v1607_v53 = vpop.xlane.xlu0 %1606 }
 0xa5d   : > { %v1608_v54 = vmul.f32 0.03125, %v1607_v53 }
 0xa5f   : > { %v1609_v55 = vadd.f32 1e-06, %v1608_v54 }
 0xa61   : > { %2119 = vrsqrt.f32 %v1609_v55 }
 0xa6b   : > { %v2120_v56 = vpop.eup %2119 }
 0xa6c   : > { %v1611_v58 = vmul.f32 %v2120_v56, %v1603_v50 }
 0xa6e   : > { %v1618_v60 = vmul.f32 %v1829_v57, %v1611_v58 }
 0xa70   : > { %v1625_v61 = vadd.f32 %v1830_v59, %v1618_v60 }
 0xa72   : > { %1626 = vst.msk [vmem:[%s670_s27] sm:$0xff] %vm710_vm1, %v1625_v61 }
 0xa73   : > { %2274 = shalt.err (!%p2271_p6)
}
 0xa74   : > { %s2275_s18 = scalar_lea.hbm %s2820_s15, 128  ;;  %s2279_s16 = scalar_lea.hbm %s2937_s6, 256 }
 0xa75   : > { %p2276_p7 = scmp.ne.s32.totalorder %s2820_s15, %s2275_s18  ;;  %p2280_p4 = scmp.lt.u32.totalorder %s2820_s15, %s2937_s6 }
 0xa76   : > { %p2281_p8 = scmp.lt.u32.totalorder %s2279_s16, %s2275_s18  ;;  %p2283_p1 = scmp.lt.u32.totalorder %s2275_s18, %s2820_s15 }
 0xa77   : > { %p2277_p9 = pnand %p2276_p7, %p2938_p10 }
 0xa78   : > { %p2282_p13 = por %p2281_p8, %p2280_p4 }
 0xa79   : > { %p2278_p12 = pneg %p2277_p9 }
 0xa7a   : > { %p2284_p11 = por %p2283_p1, %p2282_p13 }
 0xa7c   : > { %p2285_p0 = pnand %p2284_p11, %p2278_p12 }
 0xa7e   : > { %2288 = shalt.err (!%p2285_p0)
}
 0xa7f   : > { %1991 = dma.vmem_to_hbm [thread:$0]  (%p2938_p10), %s2822_s20, 128, %s2820_s15, %s1628_s17  }
 0xa80 PF: > { %s2939_s26 = sld [smem:[#allocation21_spill]]  ;;  %s2940_s27 = sld [smem:[#allocation17_spill]] }
 0xa81   : > { %s2941_s2 = sld [smem:[#allocation24_spill]] }
 0xa86   : > { %p2023_p2 = scmp.ge.s32.totalorder %s2939_s26, 2  ;;  %s1654_s0 = sand.u32 1, %s2940_s27  }
 0xa87   : > { %p2942_p3 = scmp.ne.s32.totalorder %s2941_s2, 0  ;;  %s1655_s28 = scalar_lea.sflag [#allocation5], %s1654_s0 }
 0xa89   : > { %p2010_p5 = pnand %p2023_p2, %p2942_p3 }
 0xa8b   : > { %2326 = dma.done.wait (!%p2010_p5), %s1655_s28, 128  }
 0xa8c   : > { %2328 = vsyncadd (!%p2010_p5), %s1655_s28, 4294967168  ;;  %s34_s19 = sadd.s32 1, %s2939_s26   ;;  %s2943_s27 = sld [smem:[#allocation18_spill]] }
 0xa8d   : > { %p31_p6 = scmp.ge.s32.totalorder %s34_s19, 4   ;;  %s2944_s28 = sld [smem:[#allocation19_spill]] }
 0xa8e   : > { %s2945_s29 = sld [smem:[#allocation25_spill]]  ;;  %s2946_s30 = sld [smem:[#allocation20_spill]] }
 0xa8f   : > { %s2947_s0 = sld [smem:[#allocation22_spill]]  ;;  %33 = sbr.rel (!%p31_p6) target bundleno = 16 (0x10), region = 151 }
 0xa96   :  { %1660 = vsyncpa [#allocation4], 1 }
 0xa97   :  { %1662 = vsyncpa [#allocation4 + $0x1], 1 }
 0xa98   :  { %1663 = vsyncpa [#allocation7], 1 }
 0xa99   :  { %1664 = vsyncpa [#allocation10], 1 }
 0xa9a   :  { %1665 = vsyncpa [#allocation5], 1 }
 0xa9b   :  { %1667 = vsyncpa [#allocation5 + $0x1], 1 }

</bundles_post_ra>
